<compile_context>
chip_gen: v7x
topology: tpu7x:2x2x1
jax: 0.10.0
libtpu: 0.0.40
codegen_flags: <defaults>
</compile_context>

<pallas_src>
import math

import jax
import jax.numpy as jnp
from jax.experimental import pallas as pl
from jax.experimental.pallas import tpu as pltpu

HIDDEN = 32       # cmd_args.hidden_dim
N_NODES = 16      # synthetic graph size
EPS = 0.1         # exploration epsilon (the `eps` forward argument)


# ----------------------------------------------------------------------------- fused kernel

def decoder_kernel(eps_ref,                                   # SMEM (1,1)
                   local_ref, gstate_ref,                     # (N,H), (1,H)
                   var_mask_ref, aor_mask_ref, attr_mask_ref, # (N,1) each, {0,1} f32
                   g1_ref, g2_ref, g3_ref,                    # (N,1) Gumbel noise per draw
                   w1a_ref, w1b_ref, b1_ref,                  # (3,H,H), (3,H,H), (3,1,H)
                   w2_ref, b2_ref,                            # (3,H,H/2), (3,1,H/2)
                   w3_ref, b3_ref,                            # (3,1,H/2), (3,1,1)
                   wi_ref, bi_ref, wh_ref, bh_ref,            # (H,3H), (1,3H), (H,3H), (1,3H)
                   stats_ref):                                # out: (1,8)
    n, h = local_ref.shape
    eps = eps_ref[0, 0]
    local = local_ref[...]                                    # (N, H), reused by all stages

    def score(state, mask, layer):
        # 3-layer MLP (2H->H->H/2->1, ReLU) + masked softmax over nodes + eps mixing.
        # concat(local, state) @ W1  ==  local @ W1a + state @ W1b
        h1 = jnp.maximum(
            jnp.dot(local, w1a_ref[layer], preferred_element_type=jnp.float32)
            + jnp.dot(state, w1b_ref[layer], preferred_element_type=jnp.float32)
            + b1_ref[layer], 0.0)                                              # (N, H)
        hh = jnp.maximum(
            jnp.dot(h1, w2_ref[layer], preferred_element_type=jnp.float32)
            + b2_ref[layer], 0.0)                                              # (N, H/2)
        # third layer folded into VPU multiply + lane reduce (w3 stored as a row)
        s = jnp.sum(hh * w3_ref[layer], axis=1, keepdims=True) + b3_ref[layer]  # (N, 1)

        valid = mask > 0.0
        s = jnp.where(valid, s, -1e30)
        m = jnp.max(s, axis=0, keepdims=True)
        e = jnp.where(valid, jnp.exp(s - m), 0.0)
        denom = jnp.maximum(jnp.sum(e, axis=0, keepdims=True), 1e-30)
        cnt = jnp.maximum(jnp.sum(mask, axis=0, keepdims=True), 1.0)  # == probs.shape[0] in torch
        p = jnp.where(valid, (e / denom) * (1.0 - eps) + eps / cnt, 0.0)
        return p, valid

    def sample(p, valid, gumbel):
        # Categorical(p) via Gumbel-max: argmax over valid nodes of log p + g.
        logp = jnp.where(valid, jnp.log(jnp.maximum(p, 1e-30)), -1e30)
        z = logp + gumbel                                        # masked rows stay ~-1e30
        zmax = jnp.max(z, axis=0, keepdims=True)                 # (1,1)
        iota = jax.lax.broadcasted_iota(jnp.int32, z.shape, 0).astype(jnp.float32)
        idx = jnp.max(jnp.where(z >= zmax, iota, -1.0), axis=0, keepdims=True)  # (1,1) f32
        onehot = (iota == idx).astype(jnp.float32)               # (N,1)
        p_sel = jnp.sum(p * onehot, axis=0, keepdims=True)       # (1,1) selected probability
        emb = jnp.sum(local * onehot, axis=0, keepdims=True)     # (1,H) selected local embedding
        return idx, onehot, p_sel, emb

    def gru(x, hprev):
        # nn.GRUCell(H, H) with fused gate weights: 2 matmuls, gates sliced on lanes.
        gi = jnp.dot(x, wi_ref[...], preferred_element_type=jnp.float32) + bi_ref[...]      # (1,3H)
        gh = jnp.dot(hprev, wh_ref[...], preferred_element_type=jnp.float32) + bh_ref[...]  # (1,3H)
        r = jax.nn.sigmoid(gi[:, 0:h] + gh[:, 0:h])
        zg = jax.nn.sigmoid(gi[:, h:2 * h] + gh[:, h:2 * h])
        ng = jnp.tanh(gi[:, 2 * h:3 * h] + r * gh[:, 2 * h:3 * h])
        return (1.0 - zg) * ng + zg * hprev

    state = gstate_ref[...]                                      # (1, H)
    var_mask = var_mask_ref[...]
    aor_mask = aor_mask_ref[...]
    attr_mask = attr_mask_ref[...]

    # ---- get_var1 ----
    p1, v1 = score(state, var_mask, 0)
    idx1, oh1, ps1, emb1 = sample(p1, v1, g1_ref[...])
    state = gru(emb1, state)

    # ---- get_attr_or_rela ----
    p2, v2 = score(state, aor_mask, 1)
    idx2, oh2, ps2, emb2 = sample(p2, v2, g2_ref[...])
    state = gru(emb2, state)

    # ---- get_var2 (computed unconditionally, applied only when a relation was chosen) ----
    is_attr = jnp.sum(oh2 * attr_mask, axis=0, keepdims=True)    # (1,1) in {0,1}
    var2_mask = var_mask * (1.0 - oh1)                           # locs.remove(var1_loc)
    p3, v3 = score(state, var2_mask, 2)
    idx3, _, ps3, _ = sample(p3, v3, g3_ref[...])

    prob = ps1 * ps2 * jnp.where(is_attr > 0.0, 1.0, ps3)

    # single lane-major (1,8) output: [prob, p_var1, p_aor, p_var2, is_attr, idx1, idx2, idx3]
    lane = jax.lax.broadcasted_iota(jnp.int32, (1, 8), 1)
    stats_ref[...] = (jnp.where(lane == 0, prob, 0.0)
                      + jnp.where(lane == 1, ps1, 0.0)
                      + jnp.where(lane == 2, ps2, 0.0)
                      + jnp.where(lane == 3, ps3, 0.0)
                      + jnp.where(lane == 4, is_attr, 0.0)
                      + jnp.where(lane == 5, idx1, 0.0)
                      + jnp.where(lane == 6, idx2, 0.0)
                      + jnp.where(lane == 7, idx3, 0.0))


# ----------------------------------------------------------------------------- wrapper

def _vmem():
    return pl.BlockSpec(memory_space=pltpu.MemorySpace.VMEM)


@jax.jit
def _decode_device(local_embeddings, global_embedding,
                   var_mask, attr_mask, rela_mask,
                   eps, score_params, gru_params, sample_key):
    n, _ = local_embeddings.shape
    aor_mask = jnp.logical_or(attr_mask, rela_mask)
    col = lambda m: m.astype(jnp.float32).reshape(n, 1)
    gum = jax.random.gumbel(sample_key, (3, n, 1), jnp.float32)
    eps_arr = jnp.asarray(eps, jnp.float32).reshape(1, 1)
    sp, gp = score_params, gru_params
    return pl.pallas_call(
        decoder_kernel,
        out_shape=jax.ShapeDtypeStruct((1, 8), jnp.float32),
        in_specs=[pl.BlockSpec(memory_space=pltpu.MemorySpace.SMEM)] + [_vmem()] * 19,
        out_specs=_vmem(),
    )(eps_arr,
      local_embeddings, global_embedding,
      col(var_mask), col(aor_mask), col(attr_mask),
      gum[0], gum[1], gum[2],
      sp["w1a"], sp["w1b"], sp["b1"], sp["w2"], sp["b2"], sp["w3"], sp["b3"],
      gp["wi"], gp["bi"], gp["wh"], gp["bh"])


def node_decoder_forward(local_embeddings, global_embedding,
                         var_mask, attr_mask, rela_mask,
                         eps, params, sample_key):
    """Equivalent of NodeDecoder.forward with cmd_args.global_node == False."""
    stats = _decode_device(local_embeddings, global_embedding,
                           var_mask, attr_mask, rela_mask,
                           jnp.float32(eps), params["score"], params["gru"], sample_key)
    prob = stats[0, 0]                      # device scalar for the policy-gradient loss path
    s = jax.device_get(stats)[0]            # single readback, only for host-side clause assembly
    var1_loc, aor_loc, var2_loc = int(s[5]), int(s[6]), int(s[7])
    if s[4] > 0.5:
        # TODO(synk): attr-operation / node-name lookup reads graph.config dicts; no tensor equivalent.
        clause = [("op_for_attr", aor_loc), ("attr", aor_loc), ("var", var1_loc)]
    else:
        clause = [("rela", aor_loc), ("var", var1_loc), ("var", var2_loc)]
    return prob, clause


# ----------------------------------------------------------------------------- params

def _init_linear(key, fan_in, fan_out):
    k = 1.0 / math.sqrt(fan_in)
    kw, kb = jax.random.split(key)
    w = jax.random.uniform(kw, (fan_in, fan_out), jnp.float32, -k, k)
    b = jax.random.uniform(kb, (1, fan_out), jnp.float32, -k, k)
    return w, b


def init_score_layers(key, h):
    """Stacked params for [var1, attr_or_rela, var2] score layers (2H->H->H/2->1)."""
    # NOTE: the torch module also declares attr_score_layer / rela_score_layer, which
    # forward() never uses; they are omitted here.
    h2 = h // 2
    w1a, w1b, b1, w2, b2, w3, b3 = [], [], [], [], [], [], []
    for lk in jax.random.split(key, 3):
        k1, k2, k3 = jax.random.split(lk, 3)
        w1_, b1_ = _init_linear(k1, 2 * h, h)
        w2_, b2_ = _init_linear(k2, h, h2)
        w3_, b3_ = _init_linear(k3, h2, 1)
        w1a.append(w1_[:h]); w1b.append(w1_[h:]); b1.append(b1_)
        w2.append(w2_); b2.append(b2_)
        w3.append(w3_.T); b3.append(b3_)           # w3 stored as a (1, H/2) row
    st = lambda xs: jnp.stack(xs, axis=0)
    return dict(w1a=st(w1a), w1b=st(w1b), b1=st(b1),
                w2=st(w2), b2=st(b2), w3=st(w3), b3=st(b3))


def init_gru(key, h):
    """nn.GRUCell(H, H) with fused gate layout: Wi=[Wir|Wiz|Win] (H,3H), Wh likewise."""
    k = 1.0 / math.sqrt(h)
    ki, kh, kbi, kbh = jax.random.split(key, 4)
    return dict(
        wi=jax.random.uniform(ki, (h, 3 * h), jnp.float32, -k, k),
        wh=jax.random.uniform(kh, (h, 3 * h), jnp.float32, -k, k),
        bi=jax.random.uniform(kbi, (1, 3 * h), jnp.float32, -k, k),
        bh=jax.random.uniform(kbh, (1, 3 * h), jnp.float32, -k, k))


# ----------------------------------------------------------------------------- main

if __name__ == "__main__":
    key = jax.random.PRNGKey(0)
    k_local, k_global, k_score, k_gru, k_sample = jax.random.split(key, 5)

    local_embeddings = jax.random.normal(k_local, (N_NODES, HIDDEN), jnp.float32)
    global_embedding = jax.random.normal(k_global, (1, HIDDEN), jnp.float32)

    params = {
        "score": init_score_layers(k_score, HIDDEN),   # [var1, attr_or_rela, var2]
        "gru": init_gru(k_gru, HIDDEN),
    }

    # synthetic graph structure: nodes 0..7 are variables, 8..11 attributes, 12..15 relations
    idx = jnp.arange(N_NODES)
    var_mask = idx < 8
    attr_mask = (idx >= 8) & (idx < 12)
    rela_mask = idx >= 12

    prob, clause = node_decoder_forward(
        local_embeddings, global_embedding,
        var_mask, attr_mask, rela_mask,
        EPS, params, k_sample)

    jax.block_until_ready(prob)
    print("KERNEL_OK")
</pallas_src>

<mosaic_0001>
module attributes {stable_mosaic.version = 11 : i64} {
  func.func @decoder_kernel(%arg0: memref<1x1xf32, #tpu.memory_space<smem>>, %arg1: memref<16x32xf32, #tpu.memory_space<vmem>>, %arg2: memref<1x32xf32, #tpu.memory_space<vmem>>, %arg3: memref<16x1xf32, #tpu.memory_space<vmem>>, %arg4: memref<16x1xf32, #tpu.memory_space<vmem>>, %arg5: memref<16x1xf32, #tpu.memory_space<vmem>>, %arg6: memref<16x1xf32, #tpu.memory_space<vmem>>, %arg7: memref<16x1xf32, #tpu.memory_space<vmem>>, %arg8: memref<16x1xf32, #tpu.memory_space<vmem>>, %arg9: memref<3x32x32xf32, #tpu.memory_space<vmem>>, %arg10: memref<3x32x32xf32, #tpu.memory_space<vmem>>, %arg11: memref<3x1x32xf32, #tpu.memory_space<vmem>>, %arg12: memref<3x32x16xf32, #tpu.memory_space<vmem>>, %arg13: memref<3x1x16xf32, #tpu.memory_space<vmem>>, %arg14: memref<3x1x16xf32, #tpu.memory_space<vmem>>, %arg15: memref<3x1x1xf32, #tpu.memory_space<vmem>>, %arg16: memref<32x96xf32, #tpu.memory_space<vmem>>, %arg17: memref<1x96xf32, #tpu.memory_space<vmem>>, %arg18: memref<32x96xf32, #tpu.memory_space<vmem>>, %arg19: memref<1x96xf32, #tpu.memory_space<vmem>>, %arg20: memref<1x8xf32, #tpu.memory_space<vmem>>) attributes {dimension_semantics = [], scalar_prefetch = 0 : i64, scratch_operands = 0 : i64, tpu.core_type = #tpu.core_type<tc>} {
    %c0 = arith.constant 0 : index
    %c0_0 = arith.constant 0 : index
    %0 = memref.load %arg0[%c0, %c0_0] : memref<1x1xf32, #tpu.memory_space<smem>>
    %c0_1 = arith.constant 0 : index
    %c0_2 = arith.constant 0 : index
    %1 = vector.load %arg1[%c0_1, %c0_2] : memref<16x32xf32, #tpu.memory_space<vmem>>, vector<16x32xf32>
    %c0_3 = arith.constant 0 : index
    %c0_4 = arith.constant 0 : index
    %2 = vector.load %arg2[%c0_3, %c0_4] : memref<1x32xf32, #tpu.memory_space<vmem>>, vector<1x32xf32>
    %c0_5 = arith.constant 0 : index
    %c0_6 = arith.constant 0 : index
    %3 = vector.load %arg3[%c0_5, %c0_6] : memref<16x1xf32, #tpu.memory_space<vmem>>, vector<16x1xf32>
    %c0_7 = arith.constant 0 : index
    %c0_8 = arith.constant 0 : index
    %4 = vector.load %arg4[%c0_7, %c0_8] : memref<16x1xf32, #tpu.memory_space<vmem>>, vector<16x1xf32>
    %c0_9 = arith.constant 0 : index
    %c0_10 = arith.constant 0 : index
    %5 = vector.load %arg5[%c0_9, %c0_10] : memref<16x1xf32, #tpu.memory_space<vmem>>, vector<16x1xf32>
    %c0_11 = arith.constant 0 : index
    %c0_12 = arith.constant 0 : index
    %c0_13 = arith.constant 0 : index
    %6 = vector.load %arg9[%c0_11, %c0_12, %c0_13] : memref<3x32x32xf32, #tpu.memory_space<vmem>>, vector<1x32x32xf32>
    %7 = vector.shape_cast %6 : vector<1x32x32xf32> to vector<32x32xf32>
    %cst = arith.constant dense<0.000000e+00> : vector<16x32xf32>
    %8 = tpu.matmul %1, %7, %cst {dimension_numbers = #tpu.dot_dimension_numbers<[1], [0], [0], [1], [0, 0, 1, 1], [], []>} : vector<16x32xf32>, vector<32x32xf32>, vector<16x32xf32> -> vector<16x32xf32>
    %c0_14 = arith.constant 0 : index
    %c0_15 = arith.constant 0 : index
    %c0_16 = arith.constant 0 : index
    %9 = vector.load %arg10[%c0_14, %c0_15, %c0_16] : memref<3x32x32xf32, #tpu.memory_space<vmem>>, vector<1x32x32xf32>
    %10 = vector.shape_cast %9 : vector<1x32x32xf32> to vector<32x32xf32>
    %cst_17 = arith.constant dense<0.000000e+00> : vector<1x32xf32>
    %11 = tpu.matmul %2, %10, %cst_17 {dimension_numbers = #tpu.dot_dimension_numbers<[1], [0], [0], [1], [0, 0, 1, 1], [], []>} : vector<1x32xf32>, vector<32x32xf32>, vector<1x32xf32> -> vector<1x32xf32>
    %12 = vector.broadcast %11 : vector<1x32xf32> to vector<16x32xf32>
    %13 = arith.addf %8, %12 : vector<16x32xf32>
    %c0_18 = arith.constant 0 : index
    %c0_19 = arith.constant 0 : index
    %c0_20 = arith.constant 0 : index
    %14 = vector.load %arg11[%c0_18, %c0_19, %c0_20] : memref<3x1x32xf32, #tpu.memory_space<vmem>>, vector<1x1x32xf32>
    %15 = vector.shape_cast %14 : vector<1x1x32xf32> to vector<1x32xf32>
    %16 = vector.broadcast %15 : vector<1x32xf32> to vector<16x32xf32>
    %17 = arith.addf %13, %16 : vector<16x32xf32>
    %cst_21 = arith.constant 0.000000e+00 : f32
    %18 = vector.broadcast %cst_21 : f32 to vector<16x32xf32>
    %19 = arith.maximumf %17, %18 : vector<16x32xf32>
    %c0_22 = arith.constant 0 : index
    %c0_23 = arith.constant 0 : index
    %c0_24 = arith.constant 0 : index
    %20 = vector.load %arg12[%c0_22, %c0_23, %c0_24] : memref<3x32x16xf32, #tpu.memory_space<vmem>>, vector<1x32x16xf32>
    %21 = vector.shape_cast %20 : vector<1x32x16xf32> to vector<32x16xf32>
    %cst_25 = arith.constant dense<0.000000e+00> : vector<16x16xf32>
    %22 = tpu.matmul %19, %21, %cst_25 {dimension_numbers = #tpu.dot_dimension_numbers<[1], [0], [0], [1], [0, 0, 1, 1], [], []>} : vector<16x32xf32>, vector<32x16xf32>, vector<16x16xf32> -> vector<16x16xf32>
    %c0_26 = arith.constant 0 : index
    %c0_27 = arith.constant 0 : index
    %c0_28 = arith.constant 0 : index
    %23 = vector.load %arg13[%c0_26, %c0_27, %c0_28] : memref<3x1x16xf32, #tpu.memory_space<vmem>>, vector<1x1x16xf32>
    %24 = vector.shape_cast %23 : vector<1x1x16xf32> to vector<1x16xf32>
    %25 = vector.broadcast %24 : vector<1x16xf32> to vector<16x16xf32>
    %26 = arith.addf %22, %25 : vector<16x16xf32>
    %cst_29 = arith.constant 0.000000e+00 : f32
    %27 = vector.broadcast %cst_29 : f32 to vector<16x16xf32>
    %28 = arith.maximumf %26, %27 : vector<16x16xf32>
    %c0_30 = arith.constant 0 : index
    %c0_31 = arith.constant 0 : index
    %c0_32 = arith.constant 0 : index
    %29 = vector.load %arg14[%c0_30, %c0_31, %c0_32] : memref<3x1x16xf32, #tpu.memory_space<vmem>>, vector<1x1x16xf32>
    %30 = vector.shape_cast %29 : vector<1x1x16xf32> to vector<1x16xf32>
    %31 = vector.broadcast %30 : vector<1x16xf32> to vector<16x16xf32>
    %32 = arith.mulf %28, %31 : vector<16x16xf32>
    %cst_33 = arith.constant dense<0.000000e+00> : vector<16xf32>
    %33 = vector.multi_reduction <add>, %32, %cst_33 [1] : vector<16x16xf32> to vector<16xf32>
    %34 = vector.shape_cast %33 : vector<16xf32> to vector<16x1xf32>
    %c0_34 = arith.constant 0 : index
    %c0_35 = arith.constant 0 : index
    %c0_36 = arith.constant 0 : index
    %35 = vector.load %arg15[%c0_34, %c0_35, %c0_36] : memref<3x1x1xf32, #tpu.memory_space<vmem>>, vector<1x1x1xf32>
    %36 = vector.shape_cast %35 : vector<1x1x1xf32> to vector<1x1xf32>
    %37 = vector.broadcast %36 : vector<1x1xf32> to vector<16x1xf32>
    %38 = arith.addf %34, %37 : vector<16x1xf32>
    %cst_37 = arith.constant 0.000000e+00 : f32
    %39 = vector.broadcast %cst_37 : f32 to vector<16x1xf32>
    %40 = arith.cmpf ogt, %3, %39 : vector<16x1xf32>
    %cst_38 = arith.constant -1.000000e+30 : f32
    %41 = vector.broadcast %cst_38 : f32 to vector<16x1xf32>
    %42 = arith.select %40, %38, %41 : vector<16x1xi1>, vector<16x1xf32>
    %cst_39 = arith.constant dense<0xFF800000> : vector<1xf32>
    %43 = vector.multi_reduction <maximumf>, %42, %cst_39 [0] : vector<16x1xf32> to vector<1xf32>
    %44 = vector.shape_cast %43 : vector<1xf32> to vector<1x1xf32>
    %45 = vector.broadcast %44 : vector<1x1xf32> to vector<16x1xf32>
    %46 = arith.subf %42, %45 : vector<16x1xf32>
    %47 = math.exp %46 : vector<16x1xf32>
    %cst_40 = arith.constant 0.000000e+00 : f32
    %48 = vector.broadcast %cst_40 : f32 to vector<16x1xf32>
    %49 = arith.select %40, %47, %48 : vector<16x1xi1>, vector<16x1xf32>
    %cst_41 = arith.constant dense<0.000000e+00> : vector<1xf32>
    %50 = vector.multi_reduction <add>, %49, %cst_41 [0] : vector<16x1xf32> to vector<1xf32>
    %51 = vector.shape_cast %50 : vector<1xf32> to vector<1x1xf32>
    %cst_42 = arith.constant 1.000000e-30 : f32
    %52 = vector.broadcast %cst_42 : f32 to vector<1x1xf32>
    %53 = arith.maximumf %51, %52 : vector<1x1xf32>
    %cst_43 = arith.constant dense<0.000000e+00> : vector<1xf32>
    %54 = vector.multi_reduction <add>, %3, %cst_43 [0] : vector<16x1xf32> to vector<1xf32>
    %55 = vector.shape_cast %54 : vector<1xf32> to vector<1x1xf32>
    %cst_44 = arith.constant 1.000000e+00 : f32
    %56 = vector.broadcast %cst_44 : f32 to vector<1x1xf32>
    %57 = arith.maximumf %55, %56 : vector<1x1xf32>
    %58 = vector.broadcast %53 : vector<1x1xf32> to vector<16x1xf32>
    %59 = arith.divf %49, %58 : vector<16x1xf32>
    %cst_45 = arith.constant 1.000000e+00 : f32
    %60 = arith.subf %cst_45, %0 : f32
    %61 = vector.broadcast %60 : f32 to vector<16x1xf32>
    %62 = arith.mulf %59, %61 : vector<16x1xf32>
    %63 = vector.broadcast %0 : f32 to vector<1x1xf32>
    %64 = arith.divf %63, %57 : vector<1x1xf32>
    %65 = vector.broadcast %64 : vector<1x1xf32> to vector<16x1xf32>
    %66 = arith.addf %62, %65 : vector<16x1xf32>
    %cst_46 = arith.constant 0.000000e+00 : f32
    %67 = vector.broadcast %cst_46 : f32 to vector<16x1xf32>
    %68 = arith.select %40, %66, %67 : vector<16x1xi1>, vector<16x1xf32>
    %c0_47 = arith.constant 0 : index
    %c0_48 = arith.constant 0 : index
    %69 = vector.load %arg6[%c0_47, %c0_48] : memref<16x1xf32, #tpu.memory_space<vmem>>, vector<16x1xf32>
    %cst_49 = arith.constant 1.000000e-30 : f32
    %70 = vector.broadcast %cst_49 : f32 to vector<16x1xf32>
    %71 = arith.maximumf %68, %70 : vector<16x1xf32>
    %72 = math.log %71 : vector<16x1xf32>
    %cst_50 = arith.constant -1.000000e+30 : f32
    %73 = vector.broadcast %cst_50 : f32 to vector<16x1xf32>
    %74 = arith.select %40, %72, %73 : vector<16x1xi1>, vector<16x1xf32>
    %75 = arith.addf %74, %69 : vector<16x1xf32>
    %cst_51 = arith.constant dense<0xFF800000> : vector<1xf32>
    %76 = vector.multi_reduction <maximumf>, %75, %cst_51 [0] : vector<16x1xf32> to vector<1xf32>
    %77 = vector.shape_cast %76 : vector<1xf32> to vector<1x1xf32>
    %78 = tpu.iota {dimensions = array<i32: 0>} : vector<16x1xi32>
    %79 = arith.sitofp %78 : vector<16x1xi32> to vector<16x1xf32>
    %80 = vector.broadcast %77 : vector<1x1xf32> to vector<16x1xf32>
    %81 = arith.cmpf oge, %75, %80 : vector<16x1xf32>
    %cst_52 = arith.constant -1.000000e+00 : f32
    %82 = vector.broadcast %cst_52 : f32 to vector<16x1xf32>
    %83 = arith.select %81, %79, %82 : vector<16x1xi1>, vector<16x1xf32>
    %cst_53 = arith.constant dense<0xFF800000> : vector<1xf32>
    %84 = vector.multi_reduction <maximumf>, %83, %cst_53 [0] : vector<16x1xf32> to vector<1xf32>
    %85 = vector.shape_cast %84 : vector<1xf32> to vector<1x1xf32>
    %86 = vector.broadcast %85 : vector<1x1xf32> to vector<16x1xf32>
    %87 = arith.cmpf oeq, %79, %86 : vector<16x1xf32>
    %88 = arith.extui %87 : vector<16x1xi1> to vector<16x1xi32>
    %89 = arith.sitofp %88 : vector<16x1xi32> to vector<16x1xf32>
    %90 = arith.mulf %68, %89 : vector<16x1xf32>
    %cst_54 = arith.constant dense<0.000000e+00> : vector<1xf32>
    %91 = vector.multi_reduction <add>, %90, %cst_54 [0] : vector<16x1xf32> to vector<1xf32>
    %92 = vector.shape_cast %91 : vector<1xf32> to vector<1x1xf32>
    %93 = vector.broadcast %89 : vector<16x1xf32> to vector<16x32xf32>
    %94 = arith.mulf %1, %93 : vector<16x32xf32>
    %cst_55 = arith.constant dense<0.000000e+00> : vector<32xf32>
    %95 = vector.multi_reduction <add>, %94, %cst_55 [0] : vector<16x32xf32> to vector<32xf32>
    %96 = vector.shape_cast %95 : vector<32xf32> to vector<1x32xf32>
    %c0_56 = arith.constant 0 : index
    %c0_57 = arith.constant 0 : index
    %97 = vector.load %arg16[%c0_56, %c0_57] : memref<32x96xf32, #tpu.memory_space<vmem>>, vector<32x96xf32>
    %cst_58 = arith.constant dense<0.000000e+00> : vector<1x96xf32>
    %98 = tpu.matmul %96, %97, %cst_58 {dimension_numbers = #tpu.dot_dimension_numbers<[1], [0], [0], [1], [0, 0, 1, 1], [], []>} : vector<1x32xf32>, vector<32x96xf32>, vector<1x96xf32> -> vector<1x96xf32>
    %c0_59 = arith.constant 0 : index
    %c0_60 = arith.constant 0 : index
    %99 = vector.load %arg17[%c0_59, %c0_60] : memref<1x96xf32, #tpu.memory_space<vmem>>, vector<1x96xf32>
    %100 = arith.addf %98, %99 : vector<1x96xf32>
    %c0_61 = arith.constant 0 : index
    %c0_62 = arith.constant 0 : index
    %101 = vector.load %arg18[%c0_61, %c0_62] : memref<32x96xf32, #tpu.memory_space<vmem>>, vector<32x96xf32>
    %cst_63 = arith.constant dense<0.000000e+00> : vector<1x96xf32>
    %102 = tpu.matmul %2, %101, %cst_63 {dimension_numbers = #tpu.dot_dimension_numbers<[1], [0], [0], [1], [0, 0, 1, 1], [], []>} : vector<1x32xf32>, vector<32x96xf32>, vector<1x96xf32> -> vector<1x96xf32>
    %c0_64 = arith.constant 0 : index
    %c0_65 = arith.constant 0 : index
    %103 = vector.load %arg19[%c0_64, %c0_65] : memref<1x96xf32, #tpu.memory_space<vmem>>, vector<1x96xf32>
    %104 = arith.addf %102, %103 : vector<1x96xf32>
    %105 = vector.extract_strided_slice %100 {offsets = [0, 0], sizes = [1, 32], strides = [1, 1]} : vector<1x96xf32> to vector<1x32xf32>
    %106 = vector.extract_strided_slice %104 {offsets = [0, 0], sizes = [1, 32], strides = [1, 1]} : vector<1x96xf32> to vector<1x32xf32>
    %107 = arith.addf %105, %106 : vector<1x32xf32>
    %108 = arith.negf %107 : vector<1x32xf32>
    %109 = math.exp %108 : vector<1x32xf32>
    %cst_66 = arith.constant 1.000000e+00 : f32
    %110 = vector.broadcast %cst_66 : f32 to vector<1x32xf32>
    %111 = arith.addf %110, %109 : vector<1x32xf32>
    %112 = arith.divf %110, %111 : vector<1x32xf32>
    %113 = vector.extract_strided_slice %100 {offsets = [0, 32], sizes = [1, 32], strides = [1, 1]} : vector<1x96xf32> to vector<1x32xf32>
    %114 = vector.extract_strided_slice %104 {offsets = [0, 32], sizes = [1, 32], strides = [1, 1]} : vector<1x96xf32> to vector<1x32xf32>
    %115 = arith.addf %113, %114 : vector<1x32xf32>
    %116 = arith.negf %115 : vector<1x32xf32>
    %117 = math.exp %116 : vector<1x32xf32>
    %cst_67 = arith.constant 1.000000e+00 : f32
    %118 = vector.broadcast %cst_67 : f32 to vector<1x32xf32>
    %119 = arith.addf %118, %117 : vector<1x32xf32>
    %120 = arith.divf %118, %119 : vector<1x32xf32>
    %121 = vector.extract_strided_slice %100 {offsets = [0, 64], sizes = [1, 32], strides = [1, 1]} : vector<1x96xf32> to vector<1x32xf32>
    %122 = vector.extract_strided_slice %104 {offsets = [0, 64], sizes = [1, 32], strides = [1, 1]} : vector<1x96xf32> to vector<1x32xf32>
    %123 = arith.mulf %112, %122 : vector<1x32xf32>
    %124 = arith.addf %121, %123 : vector<1x32xf32>
    %125 = math.tanh %124 : vector<1x32xf32>
    %cst_68 = arith.constant 1.000000e+00 : f32
    %126 = vector.broadcast %cst_68 : f32 to vector<1x32xf32>
    %127 = arith.subf %126, %120 : vector<1x32xf32>
    %128 = arith.mulf %127, %125 : vector<1x32xf32>
    %129 = arith.mulf %120, %2 : vector<1x32xf32>
    %130 = arith.addf %128, %129 : vector<1x32xf32>
    %c1 = arith.constant 1 : index
    %c0_69 = arith.constant 0 : index
    %c0_70 = arith.constant 0 : index
    %131 = vector.load %arg9[%c1, %c0_69, %c0_70] : memref<3x32x32xf32, #tpu.memory_space<vmem>>, vector<1x32x32xf32>
    %132 = vector.shape_cast %131 : vector<1x32x32xf32> to vector<32x32xf32>
    %cst_71 = arith.constant dense<0.000000e+00> : vector<16x32xf32>
    %133 = tpu.matmul %1, %132, %cst_71 {dimension_numbers = #tpu.dot_dimension_numbers<[1], [0], [0], [1], [0, 0, 1, 1], [], []>} : vector<16x32xf32>, vector<32x32xf32>, vector<16x32xf32> -> vector<16x32xf32>
    %c1_72 = arith.constant 1 : index
    %c0_73 = arith.constant 0 : index
    %c0_74 = arith.constant 0 : index
    %134 = vector.load %arg10[%c1_72, %c0_73, %c0_74] : memref<3x32x32xf32, #tpu.memory_space<vmem>>, vector<1x32x32xf32>
    %135 = vector.shape_cast %134 : vector<1x32x32xf32> to vector<32x32xf32>
    %cst_75 = arith.constant dense<0.000000e+00> : vector<1x32xf32>
    %136 = tpu.matmul %130, %135, %cst_75 {dimension_numbers = #tpu.dot_dimension_numbers<[1], [0], [0], [1], [0, 0, 1, 1], [], []>} : vector<1x32xf32>, vector<32x32xf32>, vector<1x32xf32> -> vector<1x32xf32>
    %137 = vector.broadcast %136 : vector<1x32xf32> to vector<16x32xf32>
    %138 = arith.addf %133, %137 : vector<16x32xf32>
    %c1_76 = arith.constant 1 : index
    %c0_77 = arith.constant 0 : index
    %c0_78 = arith.constant 0 : index
    %139 = vector.load %arg11[%c1_76, %c0_77, %c0_78] : memref<3x1x32xf32, #tpu.memory_space<vmem>>, vector<1x1x32xf32>
    %140 = vector.shape_cast %139 : vector<1x1x32xf32> to vector<1x32xf32>
    %141 = vector.broadcast %140 : vector<1x32xf32> to vector<16x32xf32>
    %142 = arith.addf %138, %141 : vector<16x32xf32>
    %cst_79 = arith.constant 0.000000e+00 : f32
    %143 = vector.broadcast %cst_79 : f32 to vector<16x32xf32>
    %144 = arith.maximumf %142, %143 : vector<16x32xf32>
    %c1_80 = arith.constant 1 : index
    %c0_81 = arith.constant 0 : index
    %c0_82 = arith.constant 0 : index
    %145 = vector.load %arg12[%c1_80, %c0_81, %c0_82] : memref<3x32x16xf32, #tpu.memory_space<vmem>>, vector<1x32x16xf32>
    %146 = vector.shape_cast %145 : vector<1x32x16xf32> to vector<32x16xf32>
    %cst_83 = arith.constant dense<0.000000e+00> : vector<16x16xf32>
    %147 = tpu.matmul %144, %146, %cst_83 {dimension_numbers = #tpu.dot_dimension_numbers<[1], [0], [0], [1], [0, 0, 1, 1], [], []>} : vector<16x32xf32>, vector<32x16xf32>, vector<16x16xf32> -> vector<16x16xf32>
    %c1_84 = arith.constant 1 : index
    %c0_85 = arith.constant 0 : index
    %c0_86 = arith.constant 0 : index
    %148 = vector.load %arg13[%c1_84, %c0_85, %c0_86] : memref<3x1x16xf32, #tpu.memory_space<vmem>>, vector<1x1x16xf32>
    %149 = vector.shape_cast %148 : vector<1x1x16xf32> to vector<1x16xf32>
    %150 = vector.broadcast %149 : vector<1x16xf32> to vector<16x16xf32>
    %151 = arith.addf %147, %150 : vector<16x16xf32>
    %cst_87 = arith.constant 0.000000e+00 : f32
    %152 = vector.broadcast %cst_87 : f32 to vector<16x16xf32>
    %153 = arith.maximumf %151, %152 : vector<16x16xf32>
    %c1_88 = arith.constant 1 : index
    %c0_89 = arith.constant 0 : index
    %c0_90 = arith.constant 0 : index
    %154 = vector.load %arg14[%c1_88, %c0_89, %c0_90] : memref<3x1x16xf32, #tpu.memory_space<vmem>>, vector<1x1x16xf32>
    %155 = vector.shape_cast %154 : vector<1x1x16xf32> to vector<1x16xf32>
    %156 = vector.broadcast %155 : vector<1x16xf32> to vector<16x16xf32>
    %157 = arith.mulf %153, %156 : vector<16x16xf32>
    %cst_91 = arith.constant dense<0.000000e+00> : vector<16xf32>
    %158 = vector.multi_reduction <add>, %157, %cst_91 [1] : vector<16x16xf32> to vector<16xf32>
    %159 = vector.shape_cast %158 : vector<16xf32> to vector<16x1xf32>
    %c1_92 = arith.constant 1 : index
    %c0_93 = arith.constant 0 : index
    %c0_94 = arith.constant 0 : index
    %160 = vector.load %arg15[%c1_92, %c0_93, %c0_94] : memref<3x1x1xf32, #tpu.memory_space<vmem>>, vector<1x1x1xf32>
    %161 = vector.shape_cast %160 : vector<1x1x1xf32> to vector<1x1xf32>
    %162 = vector.broadcast %161 : vector<1x1xf32> to vector<16x1xf32>
    %163 = arith.addf %159, %162 : vector<16x1xf32>
    %cst_95 = arith.constant 0.000000e+00 : f32
    %164 = vector.broadcast %cst_95 : f32 to vector<16x1xf32>
    %165 = arith.cmpf ogt, %4, %164 : vector<16x1xf32>
    %cst_96 = arith.constant -1.000000e+30 : f32
    %166 = vector.broadcast %cst_96 : f32 to vector<16x1xf32>
    %167 = arith.select %165, %163, %166 : vector<16x1xi1>, vector<16x1xf32>
    %cst_97 = arith.constant dense<0xFF800000> : vector<1xf32>
    %168 = vector.multi_reduction <maximumf>, %167, %cst_97 [0] : vector<16x1xf32> to vector<1xf32>
    %169 = vector.shape_cast %168 : vector<1xf32> to vector<1x1xf32>
    %170 = vector.broadcast %169 : vector<1x1xf32> to vector<16x1xf32>
    %171 = arith.subf %167, %170 : vector<16x1xf32>
    %172 = math.exp %171 : vector<16x1xf32>
    %cst_98 = arith.constant 0.000000e+00 : f32
    %173 = vector.broadcast %cst_98 : f32 to vector<16x1xf32>
    %174 = arith.select %165, %172, %173 : vector<16x1xi1>, vector<16x1xf32>
    %cst_99 = arith.constant dense<0.000000e+00> : vector<1xf32>
    %175 = vector.multi_reduction <add>, %174, %cst_99 [0] : vector<16x1xf32> to vector<1xf32>
    %176 = vector.shape_cast %175 : vector<1xf32> to vector<1x1xf32>
    %cst_100 = arith.constant 1.000000e-30 : f32
    %177 = vector.broadcast %cst_100 : f32 to vector<1x1xf32>
    %178 = arith.maximumf %176, %177 : vector<1x1xf32>
    %cst_101 = arith.constant dense<0.000000e+00> : vector<1xf32>
    %179 = vector.multi_reduction <add>, %4, %cst_101 [0] : vector<16x1xf32> to vector<1xf32>
    %180 = vector.shape_cast %179 : vector<1xf32> to vector<1x1xf32>
    %cst_102 = arith.constant 1.000000e+00 : f32
    %181 = vector.broadcast %cst_102 : f32 to vector<1x1xf32>
    %182 = arith.maximumf %180, %181 : vector<1x1xf32>
    %183 = vector.broadcast %178 : vector<1x1xf32> to vector<16x1xf32>
    %184 = arith.divf %174, %183 : vector<16x1xf32>
    %cst_103 = arith.constant 1.000000e+00 : f32
    %185 = arith.subf %cst_103, %0 : f32
    %186 = vector.broadcast %185 : f32 to vector<16x1xf32>
    %187 = arith.mulf %184, %186 : vector<16x1xf32>
    %188 = vector.broadcast %0 : f32 to vector<1x1xf32>
    %189 = arith.divf %188, %182 : vector<1x1xf32>
    %190 = vector.broadcast %189 : vector<1x1xf32> to vector<16x1xf32>
    %191 = arith.addf %187, %190 : vector<16x1xf32>
    %cst_104 = arith.constant 0.000000e+00 : f32
    %192 = vector.broadcast %cst_104 : f32 to vector<16x1xf32>
    %193 = arith.select %165, %191, %192 : vector<16x1xi1>, vector<16x1xf32>
    %c0_105 = arith.constant 0 : index
    %c0_106 = arith.constant 0 : index
    %194 = vector.load %arg7[%c0_105, %c0_106] : memref<16x1xf32, #tpu.memory_space<vmem>>, vector<16x1xf32>
    %cst_107 = arith.constant 1.000000e-30 : f32
    %195 = vector.broadcast %cst_107 : f32 to vector<16x1xf32>
    %196 = arith.maximumf %193, %195 : vector<16x1xf32>
    %197 = math.log %196 : vector<16x1xf32>
    %cst_108 = arith.constant -1.000000e+30 : f32
    %198 = vector.broadcast %cst_108 : f32 to vector<16x1xf32>
    %199 = arith.select %165, %197, %198 : vector<16x1xi1>, vector<16x1xf32>
    %200 = arith.addf %199, %194 : vector<16x1xf32>
    %cst_109 = arith.constant dense<0xFF800000> : vector<1xf32>
    %201 = vector.multi_reduction <maximumf>, %200, %cst_109 [0] : vector<16x1xf32> to vector<1xf32>
    %202 = vector.shape_cast %201 : vector<1xf32> to vector<1x1xf32>
    %203 = tpu.iota {dimensions = array<i32: 0>} : vector<16x1xi32>
    %204 = arith.sitofp %203 : vector<16x1xi32> to vector<16x1xf32>
    %205 = vector.broadcast %202 : vector<1x1xf32> to vector<16x1xf32>
    %206 = arith.cmpf oge, %200, %205 : vector<16x1xf32>
    %cst_110 = arith.constant -1.000000e+00 : f32
    %207 = vector.broadcast %cst_110 : f32 to vector<16x1xf32>
    %208 = arith.select %206, %204, %207 : vector<16x1xi1>, vector<16x1xf32>
    %cst_111 = arith.constant dense<0xFF800000> : vector<1xf32>
    %209 = vector.multi_reduction <maximumf>, %208, %cst_111 [0] : vector<16x1xf32> to vector<1xf32>
    %210 = vector.shape_cast %209 : vector<1xf32> to vector<1x1xf32>
    %211 = vector.broadcast %210 : vector<1x1xf32> to vector<16x1xf32>
    %212 = arith.cmpf oeq, %204, %211 : vector<16x1xf32>
    %213 = arith.extui %212 : vector<16x1xi1> to vector<16x1xi32>
    %214 = arith.sitofp %213 : vector<16x1xi32> to vector<16x1xf32>
    %215 = arith.mulf %193, %214 : vector<16x1xf32>
    %cst_112 = arith.constant dense<0.000000e+00> : vector<1xf32>
    %216 = vector.multi_reduction <add>, %215, %cst_112 [0] : vector<16x1xf32> to vector<1xf32>
    %217 = vector.shape_cast %216 : vector<1xf32> to vector<1x1xf32>
    %218 = vector.broadcast %214 : vector<16x1xf32> to vector<16x32xf32>
    %219 = arith.mulf %1, %218 : vector<16x32xf32>
    %cst_113 = arith.constant dense<0.000000e+00> : vector<32xf32>
    %220 = vector.multi_reduction <add>, %219, %cst_113 [0] : vector<16x32xf32> to vector<32xf32>
    %221 = vector.shape_cast %220 : vector<32xf32> to vector<1x32xf32>
    %c0_114 = arith.constant 0 : index
    %c0_115 = arith.constant 0 : index
    %222 = vector.load %arg16[%c0_114, %c0_115] : memref<32x96xf32, #tpu.memory_space<vmem>>, vector<32x96xf32>
    %cst_116 = arith.constant dense<0.000000e+00> : vector<1x96xf32>
    %223 = tpu.matmul %221, %222, %cst_116 {dimension_numbers = #tpu.dot_dimension_numbers<[1], [0], [0], [1], [0, 0, 1, 1], [], []>} : vector<1x32xf32>, vector<32x96xf32>, vector<1x96xf32> -> vector<1x96xf32>
    %c0_117 = arith.constant 0 : index
    %c0_118 = arith.constant 0 : index
    %224 = vector.load %arg17[%c0_117, %c0_118] : memref<1x96xf32, #tpu.memory_space<vmem>>, vector<1x96xf32>
    %225 = arith.addf %223, %224 : vector<1x96xf32>
    %c0_119 = arith.constant 0 : index
    %c0_120 = arith.constant 0 : index
    %226 = vector.load %arg18[%c0_119, %c0_120] : memref<32x96xf32, #tpu.memory_space<vmem>>, vector<32x96xf32>
    %cst_121 = arith.constant dense<0.000000e+00> : vector<1x96xf32>
    %227 = tpu.matmul %130, %226, %cst_121 {dimension_numbers = #tpu.dot_dimension_numbers<[1], [0], [0], [1], [0, 0, 1, 1], [], []>} : vector<1x32xf32>, vector<32x96xf32>, vector<1x96xf32> -> vector<1x96xf32>
    %c0_122 = arith.constant 0 : index
    %c0_123 = arith.constant 0 : index
    %228 = vector.load %arg19[%c0_122, %c0_123] : memref<1x96xf32, #tpu.memory_space<vmem>>, vector<1x96xf32>
    %229 = arith.addf %227, %228 : vector<1x96xf32>
    %230 = vector.extract_strided_slice %225 {offsets = [0, 0], sizes = [1, 32], strides = [1, 1]} : vector<1x96xf32> to vector<1x32xf32>
    %231 = vector.extract_strided_slice %229 {offsets = [0, 0], sizes = [1, 32], strides = [1, 1]} : vector<1x96xf32> to vector<1x32xf32>
    %232 = arith.addf %230, %231 : vector<1x32xf32>
    %233 = arith.negf %232 : vector<1x32xf32>
    %234 = math.exp %233 : vector<1x32xf32>
    %cst_124 = arith.constant 1.000000e+00 : f32
    %235 = vector.broadcast %cst_124 : f32 to vector<1x32xf32>
    %236 = arith.addf %235, %234 : vector<1x32xf32>
    %237 = arith.divf %235, %236 : vector<1x32xf32>
    %238 = vector.extract_strided_slice %225 {offsets = [0, 32], sizes = [1, 32], strides = [1, 1]} : vector<1x96xf32> to vector<1x32xf32>
    %239 = vector.extract_strided_slice %229 {offsets = [0, 32], sizes = [1, 32], strides = [1, 1]} : vector<1x96xf32> to vector<1x32xf32>
    %240 = arith.addf %238, %239 : vector<1x32xf32>
    %241 = arith.negf %240 : vector<1x32xf32>
    %242 = math.exp %241 : vector<1x32xf32>
    %cst_125 = arith.constant 1.000000e+00 : f32
    %243 = vector.broadcast %cst_125 : f32 to vector<1x32xf32>
    %244 = arith.addf %243, %242 : vector<1x32xf32>
    %245 = arith.divf %243, %244 : vector<1x32xf32>
    %246 = vector.extract_strided_slice %225 {offsets = [0, 64], sizes = [1, 32], strides = [1, 1]} : vector<1x96xf32> to vector<1x32xf32>
    %247 = vector.extract_strided_slice %229 {offsets = [0, 64], sizes = [1, 32], strides = [1, 1]} : vector<1x96xf32> to vector<1x32xf32>
    %248 = arith.mulf %237, %247 : vector<1x32xf32>
    %249 = arith.addf %246, %248 : vector<1x32xf32>
    %250 = math.tanh %249 : vector<1x32xf32>
    %cst_126 = arith.constant 1.000000e+00 : f32
    %251 = vector.broadcast %cst_126 : f32 to vector<1x32xf32>
    %252 = arith.subf %251, %245 : vector<1x32xf32>
    %253 = arith.mulf %252, %250 : vector<1x32xf32>
    %254 = arith.mulf %245, %130 : vector<1x32xf32>
    %255 = arith.addf %253, %254 : vector<1x32xf32>
    %256 = arith.mulf %214, %5 : vector<16x1xf32>
    %cst_127 = arith.constant dense<0.000000e+00> : vector<1xf32>
    %257 = vector.multi_reduction <add>, %256, %cst_127 [0] : vector<16x1xf32> to vector<1xf32>
    %258 = vector.shape_cast %257 : vector<1xf32> to vector<1x1xf32>
    %cst_128 = arith.constant 1.000000e+00 : f32
    %259 = vector.broadcast %cst_128 : f32 to vector<16x1xf32>
    %260 = arith.subf %259, %89 : vector<16x1xf32>
    %261 = arith.mulf %3, %260 : vector<16x1xf32>
    %c2 = arith.constant 2 : index
    %c0_129 = arith.constant 0 : index
    %c0_130 = arith.constant 0 : index
    %262 = vector.load %arg9[%c2, %c0_129, %c0_130] : memref<3x32x32xf32, #tpu.memory_space<vmem>>, vector<1x32x32xf32>
    %263 = vector.shape_cast %262 : vector<1x32x32xf32> to vector<32x32xf32>
    %cst_131 = arith.constant dense<0.000000e+00> : vector<16x32xf32>
    %264 = tpu.matmul %1, %263, %cst_131 {dimension_numbers = #tpu.dot_dimension_numbers<[1], [0], [0], [1], [0, 0, 1, 1], [], []>} : vector<16x32xf32>, vector<32x32xf32>, vector<16x32xf32> -> vector<16x32xf32>
    %c2_132 = arith.constant 2 : index
    %c0_133 = arith.constant 0 : index
    %c0_134 = arith.constant 0 : index
    %265 = vector.load %arg10[%c2_132, %c0_133, %c0_134] : memref<3x32x32xf32, #tpu.memory_space<vmem>>, vector<1x32x32xf32>
    %266 = vector.shape_cast %265 : vector<1x32x32xf32> to vector<32x32xf32>
    %cst_135 = arith.constant dense<0.000000e+00> : vector<1x32xf32>
    %267 = tpu.matmul %255, %266, %cst_135 {dimension_numbers = #tpu.dot_dimension_numbers<[1], [0], [0], [1], [0, 0, 1, 1], [], []>} : vector<1x32xf32>, vector<32x32xf32>, vector<1x32xf32> -> vector<1x32xf32>
    %268 = vector.broadcast %267 : vector<1x32xf32> to vector<16x32xf32>
    %269 = arith.addf %264, %268 : vector<16x32xf32>
    %c2_136 = arith.constant 2 : index
    %c0_137 = arith.constant 0 : index
    %c0_138 = arith.constant 0 : index
    %270 = vector.load %arg11[%c2_136, %c0_137, %c0_138] : memref<3x1x32xf32, #tpu.memory_space<vmem>>, vector<1x1x32xf32>
    %271 = vector.shape_cast %270 : vector<1x1x32xf32> to vector<1x32xf32>
    %272 = vector.broadcast %271 : vector<1x32xf32> to vector<16x32xf32>
    %273 = arith.addf %269, %272 : vector<16x32xf32>
    %cst_139 = arith.constant 0.000000e+00 : f32
    %274 = vector.broadcast %cst_139 : f32 to vector<16x32xf32>
    %275 = arith.maximumf %273, %274 : vector<16x32xf32>
    %c2_140 = arith.constant 2 : index
    %c0_141 = arith.constant 0 : index
    %c0_142 = arith.constant 0 : index
    %276 = vector.load %arg12[%c2_140, %c0_141, %c0_142] : memref<3x32x16xf32, #tpu.memory_space<vmem>>, vector<1x32x16xf32>
    %277 = vector.shape_cast %276 : vector<1x32x16xf32> to vector<32x16xf32>
    %cst_143 = arith.constant dense<0.000000e+00> : vector<16x16xf32>
    %278 = tpu.matmul %275, %277, %cst_143 {dimension_numbers = #tpu.dot_dimension_numbers<[1], [0], [0], [1], [0, 0, 1, 1], [], []>} : vector<16x32xf32>, vector<32x16xf32>, vector<16x16xf32> -> vector<16x16xf32>
    %c2_144 = arith.constant 2 : index
    %c0_145 = arith.constant 0 : index
    %c0_146 = arith.constant 0 : index
    %279 = vector.load %arg13[%c2_144, %c0_145, %c0_146] : memref<3x1x16xf32, #tpu.memory_space<vmem>>, vector<1x1x16xf32>
    %280 = vector.shape_cast %279 : vector<1x1x16xf32> to vector<1x16xf32>
    %281 = vector.broadcast %280 : vector<1x16xf32> to vector<16x16xf32>
    %282 = arith.addf %278, %281 : vector<16x16xf32>
    %cst_147 = arith.constant 0.000000e+00 : f32
    %283 = vector.broadcast %cst_147 : f32 to vector<16x16xf32>
    %284 = arith.maximumf %282, %283 : vector<16x16xf32>
    %c2_148 = arith.constant 2 : index
    %c0_149 = arith.constant 0 : index
    %c0_150 = arith.constant 0 : index
    %285 = vector.load %arg14[%c2_148, %c0_149, %c0_150] : memref<3x1x16xf32, #tpu.memory_space<vmem>>, vector<1x1x16xf32>
    %286 = vector.shape_cast %285 : vector<1x1x16xf32> to vector<1x16xf32>
    %287 = vector.broadcast %286 : vector<1x16xf32> to vector<16x16xf32>
    %288 = arith.mulf %284, %287 : vector<16x16xf32>
    %cst_151 = arith.constant dense<0.000000e+00> : vector<16xf32>
    %289 = vector.multi_reduction <add>, %288, %cst_151 [1] : vector<16x16xf32> to vector<16xf32>
    %290 = vector.shape_cast %289 : vector<16xf32> to vector<16x1xf32>
    %c2_152 = arith.constant 2 : index
    %c0_153 = arith.constant 0 : index
    %c0_154 = arith.constant 0 : index
    %291 = vector.load %arg15[%c2_152, %c0_153, %c0_154] : memref<3x1x1xf32, #tpu.memory_space<vmem>>, vector<1x1x1xf32>
    %292 = vector.shape_cast %291 : vector<1x1x1xf32> to vector<1x1xf32>
    %293 = vector.broadcast %292 : vector<1x1xf32> to vector<16x1xf32>
    %294 = arith.addf %290, %293 : vector<16x1xf32>
    %cst_155 = arith.constant 0.000000e+00 : f32
    %295 = vector.broadcast %cst_155 : f32 to vector<16x1xf32>
    %296 = arith.cmpf ogt, %261, %295 : vector<16x1xf32>
    %cst_156 = arith.constant -1.000000e+30 : f32
    %297 = vector.broadcast %cst_156 : f32 to vector<16x1xf32>
    %298 = arith.select %296, %294, %297 : vector<16x1xi1>, vector<16x1xf32>
    %cst_157 = arith.constant dense<0xFF800000> : vector<1xf32>
    %299 = vector.multi_reduction <maximumf>, %298, %cst_157 [0] : vector<16x1xf32> to vector<1xf32>
    %300 = vector.shape_cast %299 : vector<1xf32> to vector<1x1xf32>
    %301 = vector.broadcast %300 : vector<1x1xf32> to vector<16x1xf32>
    %302 = arith.subf %298, %301 : vector<16x1xf32>
    %303 = math.exp %302 : vector<16x1xf32>
    %cst_158 = arith.constant 0.000000e+00 : f32
    %304 = vector.broadcast %cst_158 : f32 to vector<16x1xf32>
    %305 = arith.select %296, %303, %304 : vector<16x1xi1>, vector<16x1xf32>
    %cst_159 = arith.constant dense<0.000000e+00> : vector<1xf32>
    %306 = vector.multi_reduction <add>, %305, %cst_159 [0] : vector<16x1xf32> to vector<1xf32>
    %307 = vector.shape_cast %306 : vector<1xf32> to vector<1x1xf32>
    %cst_160 = arith.constant 1.000000e-30 : f32
    %308 = vector.broadcast %cst_160 : f32 to vector<1x1xf32>
    %309 = arith.maximumf %307, %308 : vector<1x1xf32>
    %cst_161 = arith.constant dense<0.000000e+00> : vector<1xf32>
    %310 = vector.multi_reduction <add>, %261, %cst_161 [0] : vector<16x1xf32> to vector<1xf32>
    %311 = vector.shape_cast %310 : vector<1xf32> to vector<1x1xf32>
    %cst_162 = arith.constant 1.000000e+00 : f32
    %312 = vector.broadcast %cst_162 : f32 to vector<1x1xf32>
    %313 = arith.maximumf %311, %312 : vector<1x1xf32>
    %314 = vector.broadcast %309 : vector<1x1xf32> to vector<16x1xf32>
    %315 = arith.divf %305, %314 : vector<16x1xf32>
    %cst_163 = arith.constant 1.000000e+00 : f32
    %316 = arith.subf %cst_163, %0 : f32
    %317 = vector.broadcast %316 : f32 to vector<16x1xf32>
    %318 = arith.mulf %315, %317 : vector<16x1xf32>
    %319 = vector.broadcast %0 : f32 to vector<1x1xf32>
    %320 = arith.divf %319, %313 : vector<1x1xf32>
    %321 = vector.broadcast %320 : vector<1x1xf32> to vector<16x1xf32>
    %322 = arith.addf %318, %321 : vector<16x1xf32>
    %cst_164 = arith.constant 0.000000e+00 : f32
    %323 = vector.broadcast %cst_164 : f32 to vector<16x1xf32>
    %324 = arith.select %296, %322, %323 : vector<16x1xi1>, vector<16x1xf32>
    %c0_165 = arith.constant 0 : index
    %c0_166 = arith.constant 0 : index
    %325 = vector.load %arg8[%c0_165, %c0_166] : memref<16x1xf32, #tpu.memory_space<vmem>>, vector<16x1xf32>
    %cst_167 = arith.constant 1.000000e-30 : f32
    %326 = vector.broadcast %cst_167 : f32 to vector<16x1xf32>
    %327 = arith.maximumf %324, %326 : vector<16x1xf32>
    %328 = math.log %327 : vector<16x1xf32>
    %cst_168 = arith.constant -1.000000e+30 : f32
    %329 = vector.broadcast %cst_168 : f32 to vector<16x1xf32>
    %330 = arith.select %296, %328, %329 : vector<16x1xi1>, vector<16x1xf32>
    %331 = arith.addf %330, %325 : vector<16x1xf32>
    %cst_169 = arith.constant dense<0xFF800000> : vector<1xf32>
    %332 = vector.multi_reduction <maximumf>, %331, %cst_169 [0] : vector<16x1xf32> to vector<1xf32>
    %333 = vector.shape_cast %332 : vector<1xf32> to vector<1x1xf32>
    %334 = tpu.iota {dimensions = array<i32: 0>} : vector<16x1xi32>
    %335 = arith.sitofp %334 : vector<16x1xi32> to vector<16x1xf32>
    %336 = vector.broadcast %333 : vector<1x1xf32> to vector<16x1xf32>
    %337 = arith.cmpf oge, %331, %336 : vector<16x1xf32>
    %cst_170 = arith.constant -1.000000e+00 : f32
    %338 = vector.broadcast %cst_170 : f32 to vector<16x1xf32>
    %339 = arith.select %337, %335, %338 : vector<16x1xi1>, vector<16x1xf32>
    %cst_171 = arith.constant dense<0xFF800000> : vector<1xf32>
    %340 = vector.multi_reduction <maximumf>, %339, %cst_171 [0] : vector<16x1xf32> to vector<1xf32>
    %341 = vector.shape_cast %340 : vector<1xf32> to vector<1x1xf32>
    %342 = vector.broadcast %341 : vector<1x1xf32> to vector<16x1xf32>
    %343 = arith.cmpf oeq, %335, %342 : vector<16x1xf32>
    %344 = arith.extui %343 : vector<16x1xi1> to vector<16x1xi32>
    %345 = arith.sitofp %344 : vector<16x1xi32> to vector<16x1xf32>
    %346 = arith.mulf %324, %345 : vector<16x1xf32>
    %cst_172 = arith.constant dense<0.000000e+00> : vector<1xf32>
    %347 = vector.multi_reduction <add>, %346, %cst_172 [0] : vector<16x1xf32> to vector<1xf32>
    %348 = vector.shape_cast %347 : vector<1xf32> to vector<1x1xf32>
    %349 = arith.mulf %92, %217 : vector<1x1xf32>
    %cst_173 = arith.constant 0.000000e+00 : f32
    %350 = vector.broadcast %cst_173 : f32 to vector<1x1xf32>
    %351 = arith.cmpf ogt, %258, %350 : vector<1x1xf32>
    %cst_174 = arith.constant 1.000000e+00 : f32
    %352 = vector.broadcast %cst_174 : f32 to vector<1x1xf32>
    %353 = arith.select %351, %352, %348 : vector<1x1xi1>, vector<1x1xf32>
    %354 = arith.mulf %349, %353 : vector<1x1xf32>
    %355 = tpu.iota {dimensions = array<i32: 1>} : vector<1x8xi32>
    %c0_i32 = arith.constant 0 : i32
    %356 = vector.broadcast %c0_i32 : i32 to vector<1x8xi32>
    %357 = arith.cmpi eq, %355, %356 : vector<1x8xi32>
    %cst_175 = arith.constant 0.000000e+00 : f32
    %358 = vector.shape_cast %354 : vector<1x1xf32> to vector<1x1xf32>
    %359 = vector.broadcast %358 : vector<1x1xf32> to vector<1x8xf32>
    %360 = vector.broadcast %cst_175 : f32 to vector<1x8xf32>
    %361 = arith.select %357, %359, %360 : vector<1x8xi1>, vector<1x8xf32>
    %c1_i32 = arith.constant 1 : i32
    %362 = vector.broadcast %c1_i32 : i32 to vector<1x8xi32>
    %363 = arith.cmpi eq, %355, %362 : vector<1x8xi32>
    %cst_176 = arith.constant 0.000000e+00 : f32
    %364 = vector.shape_cast %92 : vector<1x1xf32> to vector<1x1xf32>
    %365 = vector.broadcast %364 : vector<1x1xf32> to vector<1x8xf32>
    %366 = vector.broadcast %cst_176 : f32 to vector<1x8xf32>
    %367 = arith.select %363, %365, %366 : vector<1x8xi1>, vector<1x8xf32>
    %368 = arith.addf %361, %367 : vector<1x8xf32>
    %c2_i32 = arith.constant 2 : i32
    %369 = vector.broadcast %c2_i32 : i32 to vector<1x8xi32>
    %370 = arith.cmpi eq, %355, %369 : vector<1x8xi32>
    %cst_177 = arith.constant 0.000000e+00 : f32
    %371 = vector.shape_cast %217 : vector<1x1xf32> to vector<1x1xf32>
    %372 = vector.broadcast %371 : vector<1x1xf32> to vector<1x8xf32>
    %373 = vector.broadcast %cst_177 : f32 to vector<1x8xf32>
    %374 = arith.select %370, %372, %373 : vector<1x8xi1>, vector<1x8xf32>
    %375 = arith.addf %368, %374 : vector<1x8xf32>
    %c3_i32 = arith.constant 3 : i32
    %376 = vector.broadcast %c3_i32 : i32 to vector<1x8xi32>
    %377 = arith.cmpi eq, %355, %376 : vector<1x8xi32>
    %cst_178 = arith.constant 0.000000e+00 : f32
    %378 = vector.shape_cast %348 : vector<1x1xf32> to vector<1x1xf32>
    %379 = vector.broadcast %378 : vector<1x1xf32> to vector<1x8xf32>
    %380 = vector.broadcast %cst_178 : f32 to vector<1x8xf32>
    %381 = arith.select %377, %379, %380 : vector<1x8xi1>, vector<1x8xf32>
    %382 = arith.addf %375, %381 : vector<1x8xf32>
    %c4_i32 = arith.constant 4 : i32
    %383 = vector.broadcast %c4_i32 : i32 to vector<1x8xi32>
    %384 = arith.cmpi eq, %355, %383 : vector<1x8xi32>
    %cst_179 = arith.constant 0.000000e+00 : f32
    %385 = vector.shape_cast %258 : vector<1x1xf32> to vector<1x1xf32>
    %386 = vector.broadcast %385 : vector<1x1xf32> to vector<1x8xf32>
    %387 = vector.broadcast %cst_179 : f32 to vector<1x8xf32>
    %388 = arith.select %384, %386, %387 : vector<1x8xi1>, vector<1x8xf32>
    %389 = arith.addf %382, %388 : vector<1x8xf32>
    %c5_i32 = arith.constant 5 : i32
    %390 = vector.broadcast %c5_i32 : i32 to vector<1x8xi32>
    %391 = arith.cmpi eq, %355, %390 : vector<1x8xi32>
    %cst_180 = arith.constant 0.000000e+00 : f32
    %392 = vector.shape_cast %85 : vector<1x1xf32> to vector<1x1xf32>
    %393 = vector.broadcast %392 : vector<1x1xf32> to vector<1x8xf32>
    %394 = vector.broadcast %cst_180 : f32 to vector<1x8xf32>
    %395 = arith.select %391, %393, %394 : vector<1x8xi1>, vector<1x8xf32>
    %396 = arith.addf %389, %395 : vector<1x8xf32>
    %c6_i32 = arith.constant 6 : i32
    %397 = vector.broadcast %c6_i32 : i32 to vector<1x8xi32>
    %398 = arith.cmpi eq, %355, %397 : vector<1x8xi32>
    %cst_181 = arith.constant 0.000000e+00 : f32
    %399 = vector.shape_cast %210 : vector<1x1xf32> to vector<1x1xf32>
    %400 = vector.broadcast %399 : vector<1x1xf32> to vector<1x8xf32>
    %401 = vector.broadcast %cst_181 : f32 to vector<1x8xf32>
    %402 = arith.select %398, %400, %401 : vector<1x8xi1>, vector<1x8xf32>
    %403 = arith.addf %396, %402 : vector<1x8xf32>
    %c7_i32 = arith.constant 7 : i32
    %404 = vector.broadcast %c7_i32 : i32 to vector<1x8xi32>
    %405 = arith.cmpi eq, %355, %404 : vector<1x8xi32>
    %cst_182 = arith.constant 0.000000e+00 : f32
    %406 = vector.shape_cast %341 : vector<1x1xf32> to vector<1x1xf32>
    %407 = vector.broadcast %406 : vector<1x1xf32> to vector<1x8xf32>
    %408 = vector.broadcast %cst_182 : f32 to vector<1x8xf32>
    %409 = arith.select %405, %407, %408 : vector<1x8xi1>, vector<1x8xf32>
    %410 = arith.addf %403, %409 : vector<1x8xf32>
    %c0_183 = arith.constant 0 : index
    %c0_184 = arith.constant 0 : index
    %411 = vector.load %arg20[%c0_183, %c0_184] : memref<1x8xf32, #tpu.memory_space<vmem>>, vector<1x8xf32>
    tpu.vector_store %arg20[%c0_183, %c0_184], %410 {strides = array<i32>} : memref<1x8xf32, #tpu.memory_space<vmem>>, vector<1x8xf32>,
    return
  }
}

</mosaic_0001>

<bundles_post_ra>
// kernel: _decode_device.1
= control target key start
LH: loop header
LB: loop body
LE: loop exit
PB: predicated region body
PF: predicated region fallthrough
CT: control target
= control target key end

     0   :  { %s2912_s0 = inlined_call_operand.<no memory space> [shape: f32[1,1], index: 0, kind: input, shape index: {}]   ;;  %s2913_s1 = inlined_call_operand.vmem [shape: f32[16,32], index: 1, kind: input, shape index: {}]   ;;  %s2914_s2 = inlined_call_operand.vmem [shape: f32[1,32], index: 2, kind: input, shape index: {}]   ;;  %s2915_s3 = inlined_call_operand.vmem [shape: f32[16,1], index: 3, kind: input, shape index: {}]   ;;  %s2916_s4 = inlined_call_operand.vmem [shape: f32[16,1], index: 4, kind: input, shape index: {}]   ;;  %s2917_s5 = inlined_call_operand.vmem [shape: f32[16,1], index: 5, kind: input, shape index: {}]   ;;  %s2918_s6 = inlined_call_operand.vmem [shape: f32[16,1], index: 6, kind: input, shape index: {}]   ;;  %s2919_s7 = inlined_call_operand.vmem [shape: f32[16,1], index: 7, kind: input, shape index: {}]   ;;  %s2920_s8 = inlined_call_operand.vmem [shape: f32[16,1], index: 8, kind: input, shape index: {}]   ;;  %s2921_s9 = inlined_call_operand.vmem [shape: f32[3,32,32], index: 9, kind: input, shape index: {}]   ;;  %s2922_s10 = inlined_call_operand.vmem [shape: f32[3,32,32], index: 10, kind: input, shape index: {}]   ;;  %s2923_s11 = inlined_call_operand.vmem [shape: f32[3,1,32], index: 11, kind: input, shape index: {}]   ;;  %s2924_s12 = inlined_call_operand.vmem [shape: f32[3,32,16], index: 12, kind: input, shape index: {}]   ;;  %s2925_s13 = inlined_call_operand.vmem [shape: f32[3,1,16], index: 13, kind: input, shape index: {}]   ;;  %s2926_s14 = inlined_call_operand.vmem [shape: f32[3,1,16], index: 14, kind: input, shape index: {}]   ;;  %s2927_s15 = inlined_call_operand.vmem [shape: f32[3,1,1], index: 15, kind: input, shape index: {}]   ;;  %s2928_s16 = inlined_call_operand.vmem [shape: f32[32,96], index: 16, kind: input, shape index: {}]   ;;  %s2929_s17 = inlined_call_operand.vmem [shape: f32[1,96], index: 17, kind: input, shape index: {}]   ;;  %s2930_s18 = inlined_call_operand.vmem [shape: f32[32,96], index: 18, kind: input, shape index: {}]   ;;  %s2931_s19 = inlined_call_operand.vmem [shape: f32[1,96], index: 19, kind: input, shape index: {}]   ;;  %s2932_s20 = inlined_call_operand.hbm [shape: f32[1,8], index: 20, kind: output, shape index: {}]  }
   0x1   :  { %2937 = sst [smem:[#allocation6_spill]] %s2912_s0 }
   0x2   :  { %2938 = sst [smem:[#allocation7_spill]] %s2913_s1 }
   0x3   :  { %2939 = sst [smem:[#allocation8_spill]] %s2914_s2 }
   0x4   :  { %2940 = sst [smem:[#allocation9_spill]] %s2915_s3 }
   0x5   :  { %2941 = sst [smem:[#allocation10_spill]] %s2916_s4 }
   0x6   :  { %v81_v0 = vld [vmem:[%s2922_s10] sm:$0xff]  ;;  %v82_v1 = vld [vmem:[%s2922_s10 + $0x8] sm:$0xff]  ;;  %v2252_v3 = vmov 0.0|0.0   ;;  %v83_v6 = vld [vmem:[%s2922_s10 + $0x10] sm:$0xff]  ;;  %vm2253_vm0 = vmmov 0   ;;  %v2254_v8 = vmov 0.0  }
   0x7   :  { %v77_v2 = vld [vmem:[%s2921_s9] sm:$0xff]  ;;  %2070 = vmatprep.subr.bf16.mxu0 %v2252_v3  ;;  %v2071_v4 = vpack.c.bf16 %v82_v1, %v81_v0  ;;  %v78_v5 = vld [vmem:[%s2921_s9 + $0x8] sm:$0xff]  ;;  %v84_v7 = vld [vmem:[%s2922_s10 + $0x18] sm:$0xff]  ;;  %1935 = vmatprep.mubr.msk.f32.mxu0 %vm2253_vm0, %v2254_v8  ;;  %vm85_vm1 = vcmask 261120   ;;  %s2942_s24 = sld [smem:[#allocation7_spill]] }
   0x8   :  { %v2076_v9 = vpack.c.bf16 %v78_v5, %v77_v2  ;;  %v79_v10 = vld [vmem:[%s2921_s9 + $0x10] sm:$0xff]  ;;  %v80_v11 = vld [vmem:[%s2921_s9 + $0x18] sm:$0xff]  ;;  %v2074_v12 = vpack.c.bf16 %v84_v7, %v83_v6 }
   0x9   :  { %2072 = vmatpush3.bf16.msra.mxu0 %v2071_v4  ;;  %v2080_v13 = vpack.c.bf16 %v80_v11, %v79_v10 }
   0xd   :  { %v2395_v14 = vld [vmem:[%s2942_s24] sm:$0xff] }
   0xe   :  { %26 = vsyncpa [#allocation4], 0  ;;  %2077 = vmatprep.subr.bf16.mxu1 %v2076_v9  ;;  %2073 = vmatprep.subr.bf16.mxu0 %v2252_v3  ;;  %s2943_s3 = sld [smem:[#allocation8_spill]]  ;;  %v2408_v16 = vld [vmem:[%s2942_s24 + $0x8] sm:$0xff]  ;;  %v255_v17 = vld [vmem:[%s2924_s12] sm:$0xff]  ;;  %v159_v23 = vlaneseq  ;;  %vm358_vm2 = vcmask 130048  }
   0xf   :  { %2079 = vmatpush3.bf16.msra.mxu1 %v2076_v9  ;;  %1946 = vmatprep.mubr.msk.f32.mxu1 %vm85_vm1, %v2395_v14  ;;  %v256_v18 = vld [vmem:[%s2924_s12 + $0x8] sm:$0xff]  ;;  %v257_v20 = vld [vmem:[%s2924_s12 + $0x10] sm:$0xff]  ;;  %v258_v21 = vld [vmem:[%s2924_s12 + $0x18] sm:$0xff]  ;;  %v2255_v50 = vmov 0   ;;  %s2944_s30 = sld [smem:[#allocation9_spill]]  ;;  %vm378_vm5 = vcmask 7168  }
  0x10   :  { %2081 = vmatprep.subr.bf16.mxu1 %v2080_v13  ;;  %2075 = vmatpush3.bf16.msra.mxu0 %v2074_v12  ;;  %v2084_v19 = vpack.c.bf16 %v256_v18, %v255_v17  ;;  %v2088_v22 = vpack.c.bf16 %v258_v21, %v257_v20  ;;  %v2431_v24 = vshrl.u32 %v159_v23, 7  ;;  %v1788_v30 = vld [vmem:[%s2923_s11] ss:$0 sm:$0xff]  ;;  %v586_v10 = vld [vmem:[%s2930_s18 + $0x8] sm:$0xff]  ;;  %v587_v11 = vld [vmem:[%s2930_s18 + $0x10] sm:$0xff]  ;;  %s2945_s28 = sld [smem:[#allocation6_spill]] }
  0x11   :  { %v1789_v38 = vld [vmem:[%s2925_s13] ss:$0 sm:$0xff]  ;;  %2168 = vset.pattern.permute.xlu1 %v2255_v50  ;;  %2179 = vset.pattern.permute.xlu0 %v2255_v50  ;;  %s2946_s27 = sld [smem:[#allocation10_spill]] }
  0x12   :  { %2085 = vmatprep.subr.bf16.mxu0 %v2084_v19  ;;  %v2434_v25 = vsub.s32 0, %v2431_v24  ;;  %v1792_v43 = vld [vmem:[%s2926_s14] ss:$0 sm:$0xff] }
  0x13   :  { %2083 = vmatpush3.bf16.msra.mxu1 %v2080_v13  ;;  %v1793_v51 = vld [vmem:[%s2927_s15] ss:$0 sm:$0xff] }
  0x14   :  { %v2403_v15 = vld [vmem:[%s2943_s3] sm:$0x1]  ;;  %2092 = vmatprep.subr.bf16.mxu1 %v2252_v3 }
  0x15   :  { %1936 = vmatmul.mubr.msk.f32.vlgmr.msra.gmra.mrb[0].mxu0 %vm85_vm1, %v2403_v15  ;;  %v2458_v52 = vld [vmem:[%s2944_s30] sm:$0xff]  ;;  %v2463_v55 = vld [vmem:[%s2944_s30 + $0x8] sm:$0xff] }
  0x16   :  { %1947 = vmatmul.mubr.msk.f32.vlgmr.msra.gmra.mrb[0].mxu1 %vm85_vm1, %v2408_v16  ;;  %2087 = vmatpush3.bf16.msra.mxu0 %v2084_v19  ;;  %vm374_vm3 = vcmp.gt.f32.partialorder %v2458_v52, 0.0  ;;  %vm375_vm4 = vcmp.gt.f32.partialorder %v2463_v55, 0.0  ;;  %v406_v5 = vsel %vm378_vm5, %v2458_v52, 0.0  ;;  %v407_v6 = vsel %vm378_vm5, %v2463_v55, 0.0  ;;  %v585_v9 = vld [vmem:[%s2930_s18] sm:$0xff]  ;;  %v588_v19 = vld [vmem:[%s2930_s18 + $0x18] sm:$0xff] }
  0x17   :  { %1968 = vmatprep.mubr.msk.f32.mxu1 %vm2253_vm0, %v2254_v8  ;;  %2089 = vmatprep.subr.bf16.mxu0 %v2088_v22  ;;  %v408_v12 = vadd.f32 %v407_v6, %v406_v5  ;;  %v2486_v18 = vpack.c.bf16 %v586_v10, %v585_v9  ;;  %s419_s4 = ssub.f32 1.0, %s2945_s28  ;;  %v431_v5 = vld [vmem:[%s2918_s6 + $0x8] sm:$0xff] }
  0x19   :  { %v2514_v50 = vstv %s419_s4  ;;  %s2256_s4 = smov 64  }
  0x1a   :  { %2091 = vmatpush3.bf16.msra.mxu0 %v2088_v22  ;;  %v2492_v22 = vpack.c.bf16 %v588_v19, %v587_v11 }
  0x1b   :  { %2098 = vmatprep.subr.bf16.mxu0 %v2252_v3 }
  0xe8   :  { %v155_v26 = vpop.f32.mrb[0].mxu0 }
  0xe9   :  { %v162_v27 = vrot.slane %v155_v26, %v2434_v25  ;;  %v1937_v28 = vpop.f32.mrb[1].mxu0  ;;  %v1948_v29 = vpop.f32.mrb[0].mxu1  ;;  %v409_v26 = vrot.slane %v408_v12, 4 }
  0xea   :  { %v235_v32 = vpop.f32.mrb[1].mxu1 }
  0xeb   :  { %v241_v31 = vadd.f32 %v1948_v29, %v162_v27  ;;  %v236_v33 = vadd.f32 %v235_v32, %v162_v27  ;;  %v410_v27 = vadd.f32 %v409_v26, %v408_v12  ;;  %v453_v26 = vadd.s32 8, %v2431_v24 }
  0xed   :  { %v252_v34 = vadd.f32 %v1788_v30, %v241_v31  ;;  %v251_v35 = vadd.f32 %v1788_v30, %v236_v33  ;;  %v411_v28 = vrot.slane %v410_v27, 2 }
  0xef   :  { %v254_v36 = vmax.f32 %v252_v34, 0.0  ;;  %v253_v37 = vmax.f32 %v251_v35, 0.0  ;;  %v412_v32 = vadd.f32 %v411_v28, %v410_v27 }
  0xf1   :  { %1957 = vmatprep.mubr.msk.f32.mxu0 %vm85_vm1, %v253_v37  ;;  %v413_v37 = vrot.slane %v412_v32, 1 }
  0xf2   :  { %1958 = vmatmul.mubr.msk.f32.vlgmr.msra.gmra.mrb[2].mxu0 %vm85_vm1, %v254_v36 }
  0xf3   :  { %1979 = vmatprep.mubr.msk.f32.mxu0 %vm2253_vm0, %v2254_v8  ;;  %2100 = vmatpush3.bf16.msra.mxu0 %v2486_v18 }
  0xf4   :  { %2101 = vmatprep.subr.bf16.mxu0 %v2252_v3 }
  0xf7   :  { %2103 = vmatpush3.bf16.msra.mxu0 %v2492_v22 }
  0xfa   :  { %1980 = vmatmul.mubr.msk.f32.vlgmr.msra.gmra.mrb[4].mxu0 %vm85_vm1, %v2403_v15 }
  0xfb   :  { %2001 = vmatprep.mubr.msk.f32.mxu0 %vm85_vm1, %v2395_v14 }
 0x1c5   :  { %v1959_v39 = vpop.f32.mrb[2].mxu0 }
 0x1c6   :  { %v344_v40 = vadd.f32 %v1959_v39, %v1789_v38  ;;  %v338_v41 = vpop.f32.mrb[3].mxu0 }
 0x1c7   :  { %v339_v42 = vadd.f32 %v1789_v38, %v338_v41 }
 0x1c8   :  { %v348_v44 = vmax.f32 %v344_v40, 0.0  ;;  %v414_v40 = vadd.f32 %v413_v37, %v412_v32 }
 0x1c9   :  { %v347_v45 = vmax.f32 %v339_v42, 0.0 }
 0x1ca   :  { %v357_v48 = vmul.f32 %v1792_v43, %v348_v44 }
 0x1cb   :  { %v356_v46 = vmul.f32 %v1792_v43, %v347_v45  ;;  %v415_v43 = vmax.f32 %v414_v40, 1.0 }
 0x1cc   :  { %v362_v49 = vsel %vm358_vm2, %v357_v48, 0.0  ;;  %v2512_v48 = vstv %s2945_s28  ;;  %s2257_s28 = smov 96  }
 0x1cd   :  { %v359_v47 = vsel %vm358_vm2, %v356_v46, 0.0 }
 0x1ce   :  { %360 = vadd.xlane.f32.xlu0 %v359_v47 }
 0x1d2   :  { %363 = vadd.xlane.f32.xlu0 %v362_v49 }
 0x25b   :  { %v361_v53 = vpop.xlane.xlu0 %360 }
 0x25c   :  { %v372_v54 = vadd.f32 %v1793_v51, %v361_v53 }
 0x25e   :  { %v376_v57 = vsel %vm374_vm3, %v372_v54, -1e+30 }
 0x25f   :  { %v364_v56 = vpop.xlane.xlu0 %363  ;;  %v379_v60 = vsel %vm378_vm5, %v376_v57, -inf }
 0x260   :  { %v373_v58 = vadd.f32 %v1793_v51, %v364_v56 }
 0x262   :  { %v377_v59 = vsel %vm375_vm4, %v373_v58, -1e+30 }
 0x263   :  { %v380_v61 = vsel %vm378_vm5, %v377_v59, -inf }
 0x264   :  { %v381_v62 = vmax.f32 %v379_v60, %v380_v61 }
 0x266   :  { %v382_v63 = vrot.slane %v381_v62, 4 }
 0x268   :  { %v383_v0 = vmax.f32 %v381_v62, %v382_v63 }
 0x26a   :  { %v384_v1 = vrot.slane %v383_v0, 2 }
 0x26c   :  { %v385_v2 = vmax.f32 %v383_v0, %v384_v1 }
 0x26e   :  { %v386_v4 = vrot.slane %v385_v2, 1 }
 0x270   :  { %v387_v7 = vmax.f32 %v385_v2, %v386_v4  ;;  %v430_v2 = vld [vmem:[%s2918_s6] sm:$0xff] }
 0x272   :  { %v388_v13 = vsub.f32 %v376_v57, %v387_v7  ;;  %v389_v17 = vsub.f32 %v377_v59, %v387_v7 }
 0x274   :  { %v390_v20 = vmul.f32 1.442695, %v388_v13  ;;  %v392_v21 = vmul.f32 1.442695, %v389_v17 }
 0x276   :  { %2180 = vpow2.f32 %v390_v20 }
 0x277   :  { %2182 = vpow2.f32 %v392_v21 }
 0x278   :  { %2184 = vrcp.f32 %v415_v43 }
 0x280   :  { %v2181_v29 = vpop.eup %2180 }
 0x281   :  { %v2183_v30 = vpop.eup %2182  ;;  %v394_v31 = vsel %vm374_vm3, %v2181_v29, 0.0  ;;  %v2537_v29 = vcvt.s32.f32 %v2431_v24 }
 0x282   :  { %v395_v33 = vsel %vm375_vm4, %v2183_v30, 0.0  ;;  %v396_v34 = vsel %vm378_vm5, %v394_v31, 0.0  ;;  %v2185_v47 = vpop.eup %2184  ;;  %v2539_v30 = vcvt.s32.f32 %v453_v26 }
 0x283   :  { %v397_v35 = vsel %vm378_vm5, %v395_v33, 0.0  ;;  %v425_v54 = vmul.f32 %v2185_v47, %v2512_v48 }
 0x284   :  { %v398_v36 = vadd.f32 %v397_v35, %v396_v34 }
 0x286   :  { %v399_v38 = vrot.slane %v398_v36, 4 }
 0x288   :  { %v400_v39 = vadd.f32 %v399_v38, %v398_v36 }
 0x28a   :  { %v401_v41 = vrot.slane %v400_v39, 2 }
 0x28c   :  { %v402_v42 = vadd.f32 %v401_v41, %v400_v39 }
 0x28e   :  { %v403_v44 = vrot.slane %v402_v42, 1 }
 0x290   :  { %v404_v45 = vadd.f32 %v403_v44, %v402_v42 }
 0x292   :  { %v405_v46 = vmax.f32 %v404_v45, 1e-30 }
 0x294   :  { %2186 = vrcp.f32 %v405_v46 }
 0x29e   :  { %v2187_v49 = vpop.eup %2186 }
 0x29f   :  { %v418_v51 = vmul.f32 %v2187_v49, %v395_v33  ;;  %v417_v53 = vmul.f32 %v2187_v49, %v394_v31 }
 0x2a1   :  { %v421_v56 = vmul.f32 %v2514_v50, %v417_v53  ;;  %v422_v57 = vmul.f32 %v2514_v50, %v418_v51 }
 0x2a3   :  { %v426_v58 = vadd.f32 %v425_v54, %v421_v56  ;;  %v427_v59 = vadd.f32 %v425_v54, %v422_v57 }
 0x2a5   :  { %v428_v60 = vsel %vm374_vm3, %v426_v58, 0.0  ;;  %v429_v61 = vsel %vm375_vm4, %v427_v59, 0.0 }
 0x2a6   :  { %v432_v62 = vmax.f32 %v428_v60, 1e-30  ;;  %v433_v63 = vmax.f32 %v429_v61, 1e-30 }
 0x2a8   :  { %2188 = vlog2.f32 %v432_v62 }
 0x2a9   :  { %2190 = vlog2.f32 %v433_v63  ;;  %v510_v63 = vld [vmem:[%s2928_s16 + $0x18] sm:$0xff] }
 0x2b2   :  { %v2189_v0 = vpop.eup %2188 }
 0x2b3   :  { %v2191_v1 = vpop.eup %2190  ;;  %v435_v4 = vmul.f32 0.6931472, %v2189_v0 }
 0x2b4   :  { %v437_v6 = vmul.f32 0.6931472, %v2191_v1  ;;  %v2592_v1 = vld [vmem:[%s2931_s19] sm:$0x1] }
 0x2b5   :  { %v438_v7 = vsel %vm374_vm3, %v435_v4, -1e+30 }
 0x2b6   :  { %v439_v9 = vsel %vm375_vm4, %v437_v6, -1e+30  ;;  %v440_v10 = vadd.f32 %v438_v7, %v430_v2  ;;  %v656_v2 = vpop.f32.mrb[4].mxu0 }
 0x2b7   :  { %v441_v11 = vadd.f32 %v439_v9, %v431_v5  ;;  %v657_v4 = vadd.f32 %v656_v2, %v2592_v1  ;;  %v1981_v5 = vpop.f32.mrb[5].mxu0  ;;  %v687_v2 = vrot.slane %v2403_v15, %v2434_v25 }
 0x2b8   :  { %v442_v12 = vsel %vm378_vm5, %v440_v10, -inf }
 0x2b9   :  { %v443_v13 = vsel %vm378_vm5, %v441_v11, -inf }
 0x2ba   :  { %v444_v17 = vmax.f32 %v442_v12, %v443_v13 }
 0x2bc   :  { %v445_v19 = vrot.slane %v444_v17, 4 }
 0x2be   :  { %v446_v20 = vmax.f32 %v444_v17, %v445_v19 }
 0x2c0   :  { %v447_v21 = vrot.slane %v446_v20, 2 }
 0x2c2   :  { %v448_v27 = vmax.f32 %v446_v20, %v447_v21 }
 0x2c4   :  { %v449_v28 = vrot.slane %v448_v27, 1 }
 0x2c6   :  { %v450_v31 = vmax.f32 %v448_v27, %v449_v28 }
 0x2c8   :  { %vm456_vm6 = vcmp.ge.f32.partialorder %v440_v10, %v450_v31  ;;  %vm457_vm7 = vcmp.ge.f32.partialorder %v441_v11, %v450_v31  ;;  %v2606_v31 = vld [vmem:[%s2929_s17] sm:$0x1] }
 0x2c9   :  { %v458_v32 = vsel %vm456_vm6, %v2537_v29, -1.0  ;;  %v459_v33 = vsel %vm457_vm7, %v2539_v30, -1.0 }
 0x2ca   :  { %v460_v34 = vsel %vm378_vm5, %v458_v32, -inf  ;;  %v461_v35 = vsel %vm378_vm5, %v459_v33, -inf }
 0x2cb   :  { %v462_v36 = vmax.f32 %v460_v34, %v461_v35 }
 0x2cd   :  { %v463_v37 = vrot.slane %v462_v36, 4 }
 0x2cf   :  { %v464_v38 = vmax.f32 %v462_v36, %v463_v37 }
 0x2d1   :  { %v465_v39 = vrot.slane %v464_v38, 2 }
 0x2d3   :  { %v466_v40 = vmax.f32 %v464_v38, %v465_v39 }
 0x2d5   :  { %v467_v24 = vrot.slane %v466_v40, 1 }
 0x2d7   :  { %v2545_v41 = vmax.f32 %v466_v40, %v467_v24 }
 0x2d9   :  { %vm469_vm8 = vcmp.eq.f32.partialorder %v2537_v29, %v2545_v41  ;;  %vm470_vm9 = vcmp.eq.f32.partialorder %v2539_v30, %v2545_v41 }
 0x2da   :  { %v1794_v42 = vsel %vm469_vm8, 1.0, %v2254_v8  ;;  %v1795_v43 = vsel %vm470_vm9, 1.0, %v2254_v8 }
 0x2db   :  { %v476_v44 = vmul.f32 %v1795_v43, %v429_v61  ;;  %v1296_v45 = vsub.f32 1.0, %v1795_v43  ;;  %v2169_v46 = vpack.i.bf16 %v1795_v43, %v1794_v42  ;;  %v475_v47 = vmul.f32 %v1794_v42, %v428_v60  ;;  %v508_v61 = vld [vmem:[%s2928_s16 + $0x8] sm:$0xff] }
 0x2dc   :  { %v1295_v49 = vsub.f32 1.0, %v1794_v42 }
 0x2dd   :  { %v478_v51 = vsel %vm378_vm5, %v476_v44, 0.0  ;;  %v2555_v53 = vmul.f32 %v1296_v45, %v2463_v55  ;;  %2170 = vperm.xlu1 %2168, %v2169_v46   ;;  %v477_v54 = vsel %vm378_vm5, %v475_v47, 0.0  ;;  %v507_v55 = vld [vmem:[%s2928_s16] sm:$0xff]  ;;  %v1800_v45 = vld [vmem:[%s2921_s9 + $0x28] sm:$0xff] }
 0x2de   :  { %v2558_v56 = vadd.f32 %v478_v51, %v477_v54  ;;  %v2561_v57 = vmul.f32 %v1295_v49, %v2458_v52  ;;  %v2575_v62 = vpack.c.bf16 %v508_v61, %v507_v55  ;;  %v509_v52 = vld [vmem:[%s2928_s16 + $0x10] sm:$0xff]  ;;  %v1799_v44 = vld [vmem:[%s2921_s9 + $0x20] sm:$0xff]  ;;  %v1804_v49 = vld [vmem:[%s2922_s10 + $0x28] sm:$0xff]  ;;  %s2258_s16 = smov 32  }
 0x2df   :  { %v1629_v58 = vsel %vm378_vm5, %v2555_v53, 0.0  ;;  %v2585_v0 = vpack.c.bf16 %v510_v63, %v509_v52  ;;  %v1803_v46 = vld [vmem:[%s2922_s10 + $0x20] sm:$0xff]  ;;  %v2110_v47 = vpack.c.bf16 %v1800_v45, %v1799_v44  ;;  %v1801_v51 = vld [vmem:[%s2921_s9 + $0x30] sm:$0xff]  ;;  %v1802_v54 = vld [vmem:[%s2921_s9 + $0x38] sm:$0xff] }
 0x2e0   :  { %v1628_v59 = vsel %vm378_vm5, %v2561_v57, 0.0  ;;  %2094 = vmatpush3.bf16.msra.mxu1 %v2575_v62  ;;  %v1805_v55 = vld [vmem:[%s2922_s10 + $0x30] sm:$0xff]  ;;  %v1806_v61 = vld [vmem:[%s2922_s10 + $0x38] sm:$0xff] }
 0x2e1   :  { %v2567_v60 = vadd.f32 %v1629_v58, %v1628_v59  ;;  %2095 = vmatprep.subr.bf16.mxu1 %v2252_v3  ;;  %668 = vrot.lane.b32.xlu1 %v657_v4, %s2256_s4  ;;  %v2105_v58 = vpack.c.bf16 %v1804_v49, %v1803_v46  ;;  %v2114_v59 = vpack.c.bf16 %v1802_v54, %v1801_v51 }
 0x2e2   :  { %2111 = vmatprep.subr.bf16.mxu0 %v2110_v47  ;;  %v2108_v63 = vpack.c.bf16 %v1806_v61, %v1805_v55  ;;  %v2703_v55 = vld [vmem:[%s2946_s27] sm:$0xff] }
 0x2e3   :  { %2113 = vmatpush3.bf16.msra.mxu0 %v2110_v47  ;;  %vm991_vm11 = vcmp.gt.f32.partialorder %v2703_v55, 0.0 }
 0x2e4   :  { %2097 = vmatpush3.bf16.msra.mxu1 %v2585_v0  ;;  %2115 = vmatprep.subr.bf16.mxu0 %v2114_v59 }
 0x2e5   :  { %2104 = vmatprep.subr.bf16.mxu1 %v2252_v3 }
 0x2e7   :  { %2117 = vmatpush3.bf16.msra.mxu0 %v2114_v59  ;;  %v1823_v59 = vld [vmem:[%s2927_s15 + $0x1] ss:$0 sm:$0xff] }
 0x2e8   :  { %2126 = vmatprep.subr.bf16.mxu0 %v2252_v3 }
 0x2ea   :  { %2002 = vmatmul.mubr.msk.f32.vlgmr.msra.gmra.mrb[6].mxu0 %vm85_vm1, %v2408_v16 }
 0x2eb   :  { %2128 = vmatpush3.bf16.msra.mxu0 %v2575_v62  ;;  %2023 = vmatprep.mubr.msk.f32.mxu0 %vm2253_vm0, %v2254_v8 }
 0x2ec   :  { %2129 = vmatprep.subr.bf16.mxu0 %v2252_v3 }
 0x2ef   :  { %2131 = vmatpush3.bf16.msra.mxu0 %v2585_v0  ;;  %v1813_v0 = vld [vmem:[%s2924_s12 + $0x28] sm:$0xff] }
 0x2f0   :  { %2138 = vmatprep.subr.bf16.mxu0 %v2252_v3 }
 0x35c   :  { %v2171_v6 = vpop.permute.xlu1 %2170 }
 0x35d   :  { %v2173_v7 = vunpack.i.h.bf16 %v2171_v6  ;;  %v2172_v9 = vunpack.i.l.bf16 %v2171_v6 }
 0x35f   :  { %v497_v10 = vmul.f32 %v2173_v7, %v2408_v16  ;;  %v496_v11 = vmul.f32 %v2172_v9, %v2395_v14 }
 0x360   :  { %v669_v39 = vpop.permute.xlu1 %668 }
 0x361   :  { %v499_v12 = vsel %vm85_vm1, %v497_v10, 0.0  ;;  %v498_v13 = vsel %vm85_vm1, %v496_v11, 0.0  ;;  %v1812_v10 = vld [vmem:[%s2924_s12 + $0x20] sm:$0xff] }
 0x362   :  { %v500_v17 = vadd.f32 %v499_v12, %v498_v13  ;;  %v2118_v11 = vpack.c.bf16 %v1813_v0, %v1812_v10 }
 0x364   :  { %v501_v19 = vrot.slane %v500_v17, 4 }
 0x366   :  { %v502_v20 = vadd.f32 %v501_v19, %v500_v17  ;;  %v1814_v17 = vld [vmem:[%s2924_s12 + $0x30] sm:$0xff]  ;;  %v1815_v19 = vld [vmem:[%s2924_s12 + $0x38] sm:$0xff] }
 0x368   :  { %v503_v21 = vrot.slane %v502_v20, 2 }
 0x36a   :  { %v504_v26 = vadd.f32 %v503_v21, %v502_v20  ;;  %v2122_v20 = vpack.c.bf16 %v1815_v19, %v1814_v17 }
 0x36c   :  { %v505_v27 = vrot.slane %v504_v26, 1 }
 0x36e   :  { %v506_v28 = vadd.f32 %v505_v27, %v504_v26 }
 0x370   :  { %1969 = vmatmul.mubr.msk.f32.vlgmr.msra.gmra.mrb[2].mxu1 %vm85_vm1, %v506_v28  ;;  %v1811_v28 = vld [vmem:[%s2923_s11 + $0x1] ss:$0 sm:$0xff] }
 0x371   :  { %1990 = vmatprep.mubr.msk.f32.mxu1 %vm2253_vm0, %v2254_v8  ;;  %2106 = vmatpush3.bf16.msra.mxu1 %v2105_v58  ;;  %v2695_v58 = vld [vmem:[%s2946_s27 + $0x8] sm:$0xff] }
 0x372   :  { %2107 = vmatprep.subr.bf16.mxu1 %v2252_v3  ;;  %vm992_vm10 = vcmp.gt.f32.partialorder %v2695_v58, 0.0 }
 0x375   :  { %2109 = vmatpush3.bf16.msra.mxu1 %v2108_v63 }
 0x376   :  { %2119 = vmatprep.subr.bf16.mxu1 %v2118_v11 }
 0x3bd   :  { %v2003_v12 = vpop.f32.mrb[6].mxu0 }
 0x3be   :  { %v848_v13 = vpop.f32.mrb[7].mxu0 }
 0x443   :  { %v581_v32 = vpop.f32.mrb[2].mxu1 }
 0x444   :  { %v582_v33 = vadd.f32 %v581_v32, %v2606_v31  ;;  %v1970_v34 = vpop.f32.mrb[3].mxu1 }
 0x446   :  { %v660_v35 = vadd.f32 %v657_v4, %v582_v33 }
 0x448   :  { %v1798_v36 = vmul.f32 -1.442695, %v660_v35 }
 0x44a   :  { %2192 = vpow2.f32 %v1798_v36 }
 0x454   :  { %v2193_v37 = vpop.eup %2192 }
 0x455   :  { %v664_v38 = vadd.f32 1.0, %v2193_v37 }
 0x457   :  { %2194 = vrcp.f32 %v664_v38  ;;  %v1817_v38 = vld [vmem:[%s2925_s13 + $0x1] ss:$0 sm:$0xff] }
 0x461   :  { %v2195_v40 = vpop.eup %2194 }
 0x462   :  { %v671_v24 = vmul.f32 %v2195_v40, %v669_v39  ;;  %v678_v4 = vsub.f32 1.0, %v2195_v40 }
 0x464   :  { %673 = vrot.lane.b32.xlu0 %v671_v24, %s2256_s4 }
 0x4d6   :  { %v674_v42 = vpop.permute.xlu0 %673 }
 0x4d7   :  { %v676_v43 = vadd.f32 %v674_v42, %v582_v33  ;;  %v1821_v42 = vld [vmem:[%s2926_s14 + $0x1] ss:$0 sm:$0xff] }
 0x4d9   :  { %2196 = vtanh.f32 %v676_v43 }
 0x4e3   :  { %v2197_v52 = vpop.eup %2196 }
 0x4e4   :  { %680 = vrot.lane.b32.xlu1 %v2197_v52, %s2257_s28 }
 0x4e8   :  { %688 = vrot.lane.b32.xlu1 %v687_v2, %s2258_s16 }
 0x556   :  { %v681_v15 = vpop.permute.xlu1 %680 }
 0x557   :  { %v683_v6 = vmul.f32 %v681_v15, %v678_v4 }
 0x55a   :  { %v689_v5 = vpop.permute.xlu1 %688 }
 0x55b   :  { %v691_v7 = vmul.f32 %v2195_v40, %v689_v5 }
 0x55d   :  { %v2647_v9 = vadd.f32 %v691_v7, %v683_v6 }
 0x55f   :  { %704 = vrot.lane.b32.xlu1 %v2647_v9, %s2257_s28 }
 0x5d1   :  { %v705_v62 = vpop.permute.xlu1 %704 }
 0x5d2   :  { %1991 = vmatmul.mubr.msk.f32.vlgmr.msra.gmra.mrb[4].mxu1 %vm85_vm1, %v705_v62 }
 0x5d3   :  { %2121 = vmatpush3.bf16.msra.mxu1 %v2118_v11 }
 0x5d4   :  { %2123 = vmatprep.subr.bf16.mxu1 %v2122_v20 }
 0x5d7   :  { %2125 = vmatpush3.bf16.msra.mxu1 %v2122_v20 }
 0x5d8   :  { %2132 = vmatprep.subr.bf16.mxu1 %v2252_v3 }
 0x6a5   :  { %v774_v21 = vpop.f32.mrb[4].mxu1 }
 0x6a6   :  { %v781_v26 = vrot.slane %v774_v21, %v2434_v25  ;;  %v1992_v27 = vpop.f32.mrb[5].mxu1 }
 0x6a8   :  { %v854_v32 = vadd.f32 %v2003_v12, %v781_v26  ;;  %v849_v33 = vadd.f32 %v848_v13, %v781_v26  ;;  %v1023_v12 = vsel %vm378_vm5, %v2695_v58, 0.0  ;;  %v1022_v13 = vsel %vm378_vm5, %v2703_v55, 0.0 }
 0x6a9   :  { %v1024_v19 = vadd.f32 %v1023_v12, %v1022_v13  ;;  %v1043_v12 = vld [vmem:[%s2919_s7] sm:$0xff] }
 0x6aa   :  { %v866_v34 = vadd.f32 %v1811_v28, %v854_v32  ;;  %v865_v35 = vadd.f32 %v1811_v28, %v849_v33 }
 0x6ab   :  { %v1025_v28 = vrot.slane %v1024_v19, 4 }
 0x6ac   :  { %v868_v36 = vmax.f32 %v866_v34, 0.0  ;;  %v867_v37 = vmax.f32 %v865_v35, 0.0 }
 0x6ad   :  { %v1026_v32 = vadd.f32 %v1025_v28, %v1024_v19 }
 0x6ae   :  { %2012 = vmatprep.mubr.msk.f32.mxu1 %vm85_vm1, %v867_v37 }
 0x6af   :  { %2013 = vmatmul.mubr.msk.f32.vlgmr.msra.gmra.mrb[6].mxu1 %vm85_vm1, %v868_v36  ;;  %v1027_v33 = vrot.slane %v1026_v32, 2 }
 0x6b0   :  { %2134 = vmatpush3.bf16.msra.mxu1 %v2486_v18  ;;  %2034 = vmatprep.mubr.msk.f32.mxu1 %vm2253_vm0, %v2254_v8 }
 0x6b1   :  { %2135 = vmatprep.subr.bf16.mxu1 %v2252_v3  ;;  %v1028_v37 = vadd.f32 %v1027_v33, %v1026_v32 }
 0x6b4   :  { %2137 = vmatpush3.bf16.msra.mxu1 %v2492_v22 }
 0x6b7   :  { %2035 = vmatmul.mubr.msk.f32.vlgmr.msra.gmra.mrb[8].mxu1 %vm85_vm1, %v705_v62 }
 0x6b8   :  { %2056 = vmatprep.mubr.msk.f32.mxu1 %vm85_vm1, %v2395_v14 }
 0x782   :  { %v2014_v39 = vpop.f32.mrb[6].mxu1 }
 0x783   :  { %v960_v40 = vadd.f32 %v2014_v39, %v1817_v38  ;;  %v954_v24 = vpop.f32.mrb[7].mxu1 }
 0x784   :  { %v955_v18 = vadd.f32 %v1817_v38, %v954_v24 }
 0x785   :  { %v964_v43 = vmax.f32 %v960_v40, 0.0 }
 0x786   :  { %v963_v44 = vmax.f32 %v955_v18, 0.0  ;;  %v1029_v18 = vrot.slane %v1028_v37, 1 }
 0x787   :  { %v974_v22 = vmul.f32 %v1821_v42, %v964_v43 }
 0x788   :  { %v973_v45 = vmul.f32 %v1821_v42, %v963_v44  ;;  %v1030_v44 = vadd.f32 %v1029_v18, %v1028_v37 }
 0x789   :  { %v978_v46 = vsel %vm358_vm2, %v974_v22, 0.0 }
 0x78a   :  { %v1254_v47 = vpop.f32.mrb[8].mxu1  ;;  %979 = vadd.xlane.f32.xlu0 %v978_v46  ;;  %v975_v49 = vsel %vm358_vm2, %v973_v45, 0.0  ;;  %v1031_v46 = vmax.f32 %v1030_v44, 1.0 }
 0x78b   :  { %v2036_v51 = vpop.f32.mrb[9].mxu1  ;;  %976 = vadd.xlane.f32.xlu1 %v975_v49  ;;  %v2688_v54 = vadd.f32 %v1254_v47, %v2592_v1 }
 0x7a0   :  { %1266 = vrot.lane.b32.xlu0 %v2688_v54, %s2256_s4 }
 0x817   :  { %v980_v1 = vpop.xlane.xlu0 %979 }
 0x818   :  { %v990_v61 = vadd.f32 %v1823_v59, %v980_v1  ;;  %v977_v52 = vpop.xlane.xlu1 %976 }
 0x819   :  { %v989_v63 = vadd.f32 %v1823_v59, %v977_v52 }
 0x81a   :  { %v994_v2 = vsel %vm992_vm10, %v990_v61, -1e+30 }
 0x81b   :  { %v996_v15 = vsel %vm378_vm5, %v994_v2, -inf  ;;  %v993_v4 = vsel %vm991_vm11, %v989_v63, -1e+30 }
 0x81c   :  { %v995_v5 = vsel %vm378_vm5, %v993_v4, -inf }
 0x81d   :  { %v997_v6 = vmax.f32 %v995_v5, %v996_v15 }
 0x81f   :  { %v998_v7 = vrot.slane %v997_v6, 4 }
 0x821   :  { %v999_v62 = vmax.f32 %v997_v6, %v998_v7 }
 0x823   :  { %v1000_v10 = vrot.slane %v999_v62, 2 }
 0x825   :  { %v1001_v0 = vmax.f32 %v999_v62, %v1000_v10 }
 0x827   :  { %v1002_v11 = vrot.slane %v1001_v0, 1 }
 0x829   :  { %v1003_v17 = vmax.f32 %v1001_v0, %v1002_v11 }
 0x82b   :  { %v1004_v20 = vsub.f32 %v993_v4, %v1003_v17  ;;  %v1005_v21 = vsub.f32 %v994_v2, %v1003_v17  ;;  %v1044_v17 = vld [vmem:[%s2919_s7 + $0x8] sm:$0xff] }
 0x82d   :  { %v1006_v26 = vmul.f32 1.442695, %v1004_v20  ;;  %v1008_v27 = vmul.f32 1.442695, %v1005_v21 }
 0x82f   :  { %2198 = vpow2.f32 %v1006_v26 }
 0x830   :  { %2200 = vpow2.f32 %v1008_v27 }
 0x831   :  { %2202 = vrcp.f32 %v1031_v46 }
 0x839   :  { %v2199_v34 = vpop.eup %2198 }
 0x83a   :  { %v2201_v35 = vpop.eup %2200  ;;  %v1010_v36 = vsel %vm991_vm11, %v2199_v34, 0.0 }
 0x83b   :  { %v1011_v38 = vsel %vm992_vm10, %v2201_v35, 0.0  ;;  %v1012_v39 = vsel %vm378_vm5, %v1010_v36, 0.0  ;;  %v2203_v59 = vpop.eup %2202 }
 0x83c   :  { %v1013_v40 = vsel %vm378_vm5, %v1011_v38, 0.0  ;;  %v1038_v63 = vmul.f32 %v2203_v59, %v2512_v48 }
 0x83d   :  { %v1014_v24 = vadd.f32 %v1013_v40, %v1012_v39 }
 0x83f   :  { %v1015_v42 = vrot.slane %v1014_v24, 4 }
 0x841   :  { %v1016_v43 = vadd.f32 %v1015_v42, %v1014_v24 }
 0x843   :  { %v1017_v22 = vrot.slane %v1016_v43, 2 }
 0x845   :  { %v1018_v45 = vadd.f32 %v1017_v22, %v1016_v43 }
 0x847   :  { %v1019_v47 = vrot.slane %v1018_v45, 1 }
 0x849   :  { %v1020_v49 = vadd.f32 %v1019_v47, %v1018_v45  ;;  %v76_v47 = vld [vmem:[%s2917_s5 + $0x8] sm:$0xff] }
 0x84b   :  { %v1021_v51 = vmax.f32 %v1020_v49, 1e-30  ;;  %v75_v49 = vld [vmem:[%s2917_s5] sm:$0xff] }
 0x84d   :  { %2204 = vrcp.f32 %v1021_v51 }
 0x857   :  { %v2205_v1 = vpop.eup %2204 }
 0x858   :  { %v1033_v61 = vmul.f32 %v2205_v1, %v1010_v36  ;;  %v1034_v52 = vmul.f32 %v2205_v1, %v1011_v38 }
 0x85a   :  { %v1035_v2 = vmul.f32 %v1033_v61, %v2514_v50  ;;  %v1036_v15 = vmul.f32 %v1034_v52, %v2514_v50 }
 0x85c   :  { %v1039_v4 = vadd.f32 %v1038_v63, %v1035_v2  ;;  %v1040_v5 = vadd.f32 %v1038_v63, %v1036_v15 }
 0x85e   :  { %v1041_v6 = vsel %vm991_vm11, %v1039_v4, 0.0  ;;  %v1042_v7 = vsel %vm992_vm10, %v1040_v5, 0.0 }
 0x85f   :  { %v1045_v62 = vmax.f32 %v1041_v6, 1e-30  ;;  %v1046_v10 = vmax.f32 %v1042_v7, 1e-30 }
 0x861   :  { %2206 = vlog2.f32 %v1045_v62 }
 0x862   :  { %2208 = vlog2.f32 %v1046_v10 }
 0x86b   :  { %v2207_v0 = vpop.eup %2206 }
 0x86c   :  { %v2209_v11 = vpop.eup %2208  ;;  %v1048_v13 = vmul.f32 0.6931472, %v2207_v0 }
 0x86d   :  { %v1050_v19 = vmul.f32 0.6931472, %v2209_v11 }
 0x86e   :  { %v1051_v20 = vsel %vm991_vm11, %v1048_v13, -1e+30 }
 0x86f   :  { %v1052_v21 = vsel %vm992_vm10, %v1050_v19, -1e+30  ;;  %v1053_v26 = vadd.f32 %v1051_v20, %v1043_v12 }
 0x870   :  { %v1054_v27 = vadd.f32 %v1052_v21, %v1044_v17 }
 0x871   :  { %v1055_v28 = vsel %vm378_vm5, %v1053_v26, -inf }
 0x872   :  { %v1056_v32 = vsel %vm378_vm5, %v1054_v27, -inf }
 0x873   :  { %v1057_v33 = vmax.f32 %v1055_v28, %v1056_v32 }
 0x875   :  { %v1058_v34 = vrot.slane %v1057_v33, 4 }
 0x877   :  { %v1059_v35 = vmax.f32 %v1057_v33, %v1058_v34 }
 0x879   :  { %v1060_v36 = vrot.slane %v1059_v35, 2 }
 0x87b   :  { %v1061_v37 = vmax.f32 %v1059_v35, %v1060_v36 }
 0x87d   :  { %v1062_v38 = vrot.slane %v1061_v37, 1 }
 0x87f   :  { %v1063_v39 = vmax.f32 %v1061_v37, %v1062_v38 }
 0x881   :  { %vm1064_vm12 = vcmp.ge.f32.partialorder %v1053_v26, %v1063_v39  ;;  %vm1065_vm13 = vcmp.ge.f32.partialorder %v1054_v27, %v1063_v39 }
 0x882   :  { %v1066_v55 = vsel %vm1064_vm12, %v2537_v29, -1.0  ;;  %v1067_v58 = vsel %vm1065_vm13, %v2539_v30, -1.0 }
 0x883   :  { %v1068_v40 = vsel %vm378_vm5, %v1066_v55, -inf  ;;  %v1069_v24 = vsel %vm378_vm5, %v1067_v58, -inf  ;;  %v1267_v58 = vpop.permute.xlu0 %1266 }
 0x884   :  { %v1070_v18 = vmax.f32 %v1068_v40, %v1069_v24 }
 0x886   :  { %v1071_v42 = vrot.slane %v1070_v18, 4 }
 0x888   :  { %v1072_v43 = vmax.f32 %v1070_v18, %v1071_v42  ;;  %v1833_v42 = vld [vmem:[%s2922_s10 + $0x40] sm:$0xff] }
 0x88a   :  { %v1073_v44 = vrot.slane %v1072_v43, 2 }
 0x88c   :  { %v1074_v22 = vmax.f32 %v1072_v43, %v1073_v44  ;;  %v1834_v44 = vld [vmem:[%s2922_s10 + $0x48] sm:$0xff] }
 0x88e   :  { %v1075_v45 = vrot.slane %v1074_v22, 1 }
 0x890   :  { %v2746_v46 = vmax.f32 %v1074_v22, %v1075_v45  ;;  %v1831_v22 = vld [vmem:[%s2921_s9 + $0x50] sm:$0xff]  ;;  %v1832_v45 = vld [vmem:[%s2921_s9 + $0x58] sm:$0xff] }
 0x892   :  { %vm1077_vm14 = vcmp.eq.f32.partialorder %v2537_v29, %v2746_v46  ;;  %vm1078_vm15 = vcmp.eq.f32.partialorder %v2539_v30, %v2746_v46 }
 0x893   :  { %v1824_v51 = vsel %vm1077_vm14, 1.0, %v2254_v8  ;;  %v1825_v59 = vsel %vm1078_vm15, 1.0, %v2254_v8  ;;  %vm1769_vm15 = vcmask 57344  }
 0x894   :  { %v1084_v1 = vmul.f32 %v1825_v59, %v1042_v7  ;;  %v1285_v61 = vmul.f32 %v1825_v59, %v76_v47  ;;  %v2174_v52 = vpack.i.bf16 %v1825_v59, %v1824_v51  ;;  %v1083_v63 = vmul.f32 %v1824_v51, %v1041_v6  ;;  %v1836_v59 = vld [vmem:[%s2922_s10 + $0x58] sm:$0xff] }
 0x895   :  { %v1284_v2 = vmul.f32 %v1824_v51, %v75_v49  ;;  %v2139_v47 = vpack.c.bf16 %v1834_v44, %v1833_v42  ;;  %v2148_v49 = vpack.c.bf16 %v1832_v45, %v1831_v22  ;;  %v1835_v51 = vld [vmem:[%s2922_s10 + $0x50] sm:$0xff] }
 0x896   :  { %v1086_v15 = vsel %vm378_vm5, %v1084_v1, 0.0  ;;  %v1287_v4 = vsel %vm378_vm5, %v1285_v61, 0.0  ;;  %2175 = vperm.xlu1 %2168, %v2174_v52   ;;  %v1085_v5 = vsel %vm378_vm5, %v1083_v63, 0.0  ;;  %v2142_v1 = vpack.c.bf16 %v1836_v59, %v1835_v51 }
 0x897   :  { %v1286_v62 = vsel %vm378_vm5, %v1284_v2, 0.0  ;;  %v2764_v10 = vadd.f32 %v1086_v15, %v1085_v5 }
 0x898   :  { %v2766_v0 = vadd.f32 %v1287_v4, %v1286_v62  ;;  %v1843_v62 = vld [vmem:[%s2924_s12 + $0x48] sm:$0xff] }
 0x915   :  { %v2176_v11 = vpop.permute.xlu1 %2175 }
 0x916   :  { %v2178_v12 = vunpack.i.h.bf16 %v2176_v11  ;;  %v2177_v7 = vunpack.i.l.bf16 %v2176_v11 }
 0x918   :  { %v1105_v13 = vmul.f32 %v2178_v12, %v2408_v16  ;;  %v1104_v6 = vmul.f32 %v2177_v7, %v2395_v14  ;;  %v1845_v7 = vld [vmem:[%s2924_s12 + $0x58] sm:$0xff] }
 0x91a   :  { %v1107_v17 = vsel %vm85_vm1, %v1105_v13, 0.0  ;;  %v1106_v19 = vsel %vm85_vm1, %v1104_v6, 0.0 }
 0x91b   :  { %v1108_v20 = vadd.f32 %v1107_v17, %v1106_v19 }
 0x91d   :  { %v1109_v21 = vrot.slane %v1108_v20, 4 }
 0x91f   :  { %v1110_v26 = vadd.f32 %v1109_v21, %v1108_v20  ;;  %v1841_v20 = vld [vmem:[%s2923_s11 + $0x2] ss:$0 sm:$0xff] }
 0x921   :  { %v1111_v27 = vrot.slane %v1110_v26, 2 }
 0x923   :  { %v1112_v28 = vadd.f32 %v1111_v27, %v1110_v26 }
 0x925   :  { %v1113_v32 = vrot.slane %v1112_v28, 1 }
 0x927   :  { %v1114_v33 = vadd.f32 %v1113_v32, %v1112_v28 }
 0x929   :  { %2024 = vmatmul.mubr.msk.f32.vlgmr.msra.gmra.mrb[8].mxu0 %vm85_vm1, %v1114_v33 }
 0x92a   :  { %2045 = vmatprep.mubr.msk.f32.mxu0 %vm2253_vm0, %v2254_v8  ;;  %2140 = vmatpush3.bf16.msra.mxu0 %v2139_v47  ;;  %vm1598_vm0 = vcmp.gt.f32.partialorder %v2555_v53, 0.0 }
 0x92b   :  { %2141 = vmatprep.subr.bf16.mxu0 %v2252_v3  ;;  %v1842_v3 = vld [vmem:[%s2924_s12 + $0x40] sm:$0xff] }
 0x92c   :  { %v2152_v11 = vpack.c.bf16 %v1843_v62, %v1842_v3 }
 0x92e   :  { %2143 = vmatpush3.bf16.msra.mxu0 %v2142_v1 }
 0x92f   :  { %2153 = vmatprep.subr.bf16.mxu0 %v2152_v11 }
 0x9fc   :  { %v1184_v34 = vpop.f32.mrb[8].mxu0 }
 0x9fd   :  { %v1185_v35 = vadd.f32 %v1184_v34, %v2606_v31  ;;  %v2025_v14 = vpop.f32.mrb[9].mxu0  ;;  %v1829_v31 = vld [vmem:[%s2921_s9 + $0x40] sm:$0xff] }
 0x9fe   :  { %v1847_v34 = vld [vmem:[%s2925_s13 + $0x2] ss:$0 sm:$0xff] }
 0x9ff   :  { %v1258_v36 = vadd.f32 %v2688_v54, %v1185_v35  ;;  %v1830_v54 = vld [vmem:[%s2921_s9 + $0x48] sm:$0xff] }
 0xa00   :  { %v2144_v43 = vpack.c.bf16 %v1830_v54, %v1829_v31  ;;  %v1088_v31 = vrot.slane %v2764_v10, 4 }
 0xa01   :  { %v1828_v37 = vmul.f32 -1.442695, %v1258_v36 }
 0xa02   :  { %2145 = vmatprep.subr.bf16.mxu1 %v2144_v43 }
 0xa03   :  { %2210 = vpow2.f32 %v1828_v37  ;;  %2147 = vmatpush3.bf16.msra.mxu1 %v2144_v43  ;;  %v1851_v37 = vld [vmem:[%s2926_s14 + $0x2] ss:$0 sm:$0xff]  ;;  %v1089_v43 = vadd.f32 %v1088_v31, %v2764_v10 }
 0xa04   :  { %2149 = vmatprep.subr.bf16.mxu1 %v2148_v49 }
 0xa05   :  { %v1090_v22 = vrot.slane %v1089_v43, 2 }
 0xa07   :  { %2151 = vmatpush3.bf16.msra.mxu1 %v2148_v49  ;;  %v1091_v47 = vadd.f32 %v1090_v22, %v1089_v43 }
 0xa09   :  { %v1092_v51 = vrot.slane %v1091_v47, 1 }
 0xa0a   :  { %2057 = vmatmul.mubr.msk.f32.vlgmr.msra.gmra.mrb[10].mxu1 %vm85_vm1, %v2408_v16 }
 0xa0b   :  { %v2842_v59 = vadd.f32 %v1092_v51, %v1091_v47 }
 0xa0d   :  { %v2211_v38 = vpop.eup %2210 }
 0xa0e   :  { %v1262_v39 = vadd.f32 1.0, %v2211_v38 }
 0xa10   :  { %2212 = vrcp.f32 %v1262_v39  ;;  %v480_v39 = vrot.slane %v2558_v56, 4 }
 0xa1a   :  { %v2213_v55 = vpop.eup %2212 }
 0xa1b   :  { %v1269_v40 = vmul.f32 %v2213_v55, %v1267_v58  ;;  %v1276_v52 = vsub.f32 1.0, %v2213_v55  ;;  %v1282_v2 = vmul.f32 %v2213_v55, %v2647_v9  ;;  %v1844_v9 = vld [vmem:[%s2924_s12 + $0x50] sm:$0xff] }
 0xa1c   :  { %v2156_v13 = vpack.c.bf16 %v1845_v7, %v1844_v9 }
 0xa1d   :  { %1271 = vrot.lane.b32.xlu1 %v1269_v40, %s2256_s4 }
 0xa8f   :  { %v1272_v24 = vpop.permute.xlu1 %1271 }
 0xa90   :  { %v1274_v18 = vadd.f32 %v1272_v24, %v1185_v35 }
 0xa92   :  { %2214 = vtanh.f32 %v1274_v18  ;;  %v481_v18 = vadd.f32 %v480_v39, %v2558_v56  ;;  %v1853_v56 = vld [vmem:[%s2927_s15 + $0x2] ss:$0 sm:$0xff] }
 0xa94   :  { %v482_v42 = vrot.slane %v481_v18, 2 }
 0xa96   :  { %v483_v44 = vadd.f32 %v482_v42, %v481_v18 }
 0xa98   :  { %v484_v45 = vrot.slane %v483_v44, 1 }
 0xa9a   :  { %v2839_v49 = vadd.f32 %v484_v45, %v483_v44 }
 0xa9c   :  { %v2215_v61 = vpop.eup %2214 }
 0xa9d   :  { %1278 = vrot.lane.b32.xlu1 %v2215_v61, %s2257_s28 }
 0xadd   :  { %v2058_v16 = vpop.f32.mrb[10].mxu1 }
 0xade   :  { %v1454_v12 = vpop.f32.mrb[11].mxu1 }
 0xb0f   :  { %v1279_v63 = vpop.permute.xlu1 %1278 }
 0xb10   :  { %v1281_v15 = vmul.f32 %v1279_v63, %v1276_v52 }
 0xb12   :  { %v1283_v4 = vadd.f32 %v1282_v2, %v1281_v15 }
 0xb14   :  { %1310 = vrot.lane.b32.xlu1 %v1283_v4, %s2257_s28 }
 0xb86   :  { %v1311_v5 = vpop.permute.xlu1 %1310 }
 0xb87   :  { %2046 = vmatmul.mubr.msk.f32.vlgmr.msra.gmra.mrb[10].mxu0 %vm85_vm1, %v1311_v5 }
 0xb88   :  { %2155 = vmatpush3.bf16.msra.mxu0 %v2152_v11 }
 0xb89   :  { %2157 = vmatprep.subr.bf16.mxu0 %v2156_v13 }
 0xb8c   :  { %2159 = vmatpush3.bf16.msra.mxu0 %v2156_v13 }
 0xc5a   :  { %v1380_v6 = vpop.f32.mrb[10].mxu0 }
 0xc5b   :  { %v1387_v17 = vrot.slane %v1380_v6, %v2434_v25  ;;  %v2047_v19 = vpop.f32.mrb[11].mxu0 }
 0xc5c   :  { %v1631_v19 = vrot.slane %v2567_v60, 4 }
 0xc5d   :  { %v1460_v21 = vadd.f32 %v2058_v16, %v1387_v17  ;;  %v1455_v26 = vadd.f32 %v1454_v12, %v1387_v17 }
 0xc5f   :  { %v1472_v27 = vadd.f32 %v1841_v20, %v1460_v21  ;;  %v1471_v28 = vadd.f32 %v1841_v20, %v1455_v26  ;;  %v1632_v20 = vadd.f32 %v1631_v19, %v2567_v60 }
 0xc61   :  { %v1474_v32 = vmax.f32 %v1472_v27, 0.0  ;;  %v1473_v33 = vmax.f32 %v1471_v28, 0.0  ;;  %v1633_v21 = vrot.slane %v1632_v20, 2 }
 0xc63   :  { %2067 = vmatprep.mubr.msk.f32.mxu0 %vm85_vm1, %v1473_v33 }
 0xc64   :  { %2068 = vmatmul.mubr.msk.f32.vlgmr.msra.gmra.mrb[12].mxu0 %vm85_vm1, %v1474_v32  ;;  %vm1597_vm1 = vcmp.gt.f32.partialorder %v2561_v57, 0.0 }
 0xd37   :  { %v2069_v25 = vpop.f32.mrb[12].mxu0 }
 0xd38   :  { %v1566_v35 = vadd.f32 %v2069_v25, %v1847_v34  ;;  %v1560_v14 = vpop.f32.mrb[13].mxu0 }
 0xd39   :  { %v1561_v36 = vadd.f32 %v1847_v34, %v1560_v14  ;;  %v1634_v34 = vadd.f32 %v1633_v21, %v1632_v20 }
 0xd3a   :  { %v1570_v38 = vmax.f32 %v1566_v35, 0.0 }
 0xd3b   :  { %v1569_v55 = vmax.f32 %v1561_v36, 0.0  ;;  %v1635_v36 = vrot.slane %v1634_v34, 1 }
 0xd3c   :  { %v1580_v58 = vmul.f32 %v1851_v37, %v1570_v38 }
 0xd3d   :  { %v1579_v40 = vmul.f32 %v1851_v37, %v1569_v55  ;;  %v1636_v60 = vadd.f32 %v1635_v36, %v1634_v34 }
 0xd3e   :  { %v1584_v24 = vsel %vm358_vm2, %v1580_v58, 0.0 }
 0xd3f   :  { %1585 = vadd.xlane.f32.xlu1 %v1584_v24  ;;  %v1581_v54 = vsel %vm358_vm2, %v1579_v40, 0.0  ;;  %v1637_v58 = vmax.f32 %v1636_v60, 1.0 }
 0xd40   :  { %1582 = vadd.xlane.f32.xlu0 %v1581_v54 }
 0xd50   :  { %1716 = vperm.xlu1 %2168, %v2839_v49  }
 0xd54   :  { %1724 = vperm.xlu1 %2168, %v2842_v59  }
 0xdcc   :  { %v1586_v1 = vpop.xlane.xlu1 %1585 }
 0xdcd   :  { %v1596_v61 = vadd.f32 %v1853_v56, %v1586_v1  ;;  %v1583_v10 = vpop.xlane.xlu0 %1582 }
 0xdce   :  { %v1595_v52 = vadd.f32 %v1853_v56, %v1583_v10 }
 0xdcf   :  { %v1600_v63 = vsel %vm1598_vm0, %v1596_v61, -1e+30 }
 0xdd0   :  { %v1602_v2 = vsel %vm378_vm5, %v1600_v63, -inf  ;;  %v1599_v15 = vsel %vm1597_vm1, %v1595_v52, -1e+30 }
 0xdd1   :  { %v1601_v4 = vsel %vm378_vm5, %v1599_v15, -inf }
 0xdd2   :  { %v1603_v5 = vmax.f32 %v1601_v4, %v1602_v2 }
 0xdd4   :  { %v1604_v3 = vrot.slane %v1603_v5, 4 }
 0xdd6   :  { %v1605_v62 = vmax.f32 %v1603_v5, %v1604_v3 }
 0xdd8   :  { %v1606_v16 = vrot.slane %v1605_v62, 2 }
 0xdda   :  { %v1607_v11 = vmax.f32 %v1605_v62, %v1606_v16 }
 0xddc   :  { %v1608_v12 = vrot.slane %v1607_v11, 1 }
 0xdde   :  { %v1609_v9 = vmax.f32 %v1607_v11, %v1608_v12 }
 0xde0   :  { %v1610_v7 = vsub.f32 %v1599_v15, %v1609_v9  ;;  %v1611_v13 = vsub.f32 %v1600_v63, %v1609_v9 }
 0xde2   :  { %v1612_v6 = vmul.f32 1.442695, %v1610_v7  ;;  %v1614_v17 = vmul.f32 1.442695, %v1611_v13 }
 0xde4   :  { %2216 = vpow2.f32 %v1612_v6 }
 0xde5   :  { %2218 = vpow2.f32 %v1614_v17 }
 0xde6   :  { %2220 = vrcp.f32 %v1637_v58 }
 0xdee   :  { %v2217_v26 = vpop.eup %2216 }
 0xdef   :  { %v2219_v27 = vpop.eup %2218  ;;  %v1616_v28 = vsel %vm1597_vm1, %v2217_v26, 0.0 }
 0xdf0   :  { %v1617_v32 = vsel %vm1598_vm0, %v2219_v27, 0.0  ;;  %v1618_v33 = vsel %vm378_vm5, %v1616_v28, 0.0  ;;  %v2221_v18 = vpop.eup %2220 }
 0xdf1   :  { %v1619_v25 = vsel %vm378_vm5, %v1617_v32, 0.0  ;;  %v1644_v22 = vmul.f32 %v2221_v18, %v2512_v48  ;;  %v1650_v48 = vld [vmem:[%s2920_s8 + $0x8] sm:$0xff] }
 0xdf2   :  { %v1620_v35 = vadd.f32 %v1619_v25, %v1618_v33 }
 0xdf4   :  { %v1621_v14 = vrot.slane %v1620_v35, 4 }
 0xdf6   :  { %v1622_v37 = vadd.f32 %v1621_v14, %v1620_v35 }
 0xdf8   :  { %v1623_v38 = vrot.slane %v1622_v37, 2 }
 0xdfa   :  { %v1624_v39 = vadd.f32 %v1623_v38, %v1622_v37 }
 0xdfc   :  { %v1625_v55 = vrot.slane %v1624_v39, 1 }
 0xdfe   :  { %v1626_v40 = vadd.f32 %v1625_v55, %v1624_v39 }
 0xe00   :  { %v1627_v24 = vmax.f32 %v1626_v40, 1e-30 }
 0xe02   :  { %2222 = vrcp.f32 %v1627_v24 }
 0xe0c   :  { %v2223_v31 = vpop.eup %2222 }
 0xe0d   :  { %v1639_v54 = vmul.f32 %v2223_v31, %v1616_v28  ;;  %v1640_v42 = vmul.f32 %v2223_v31, %v1617_v32  ;;  %v1289_v32 = vrot.slane %v2766_v0, 4 }
 0xe0f   :  { %v1641_v43 = vmul.f32 %v1639_v54, %v2514_v50  ;;  %v1642_v44 = vmul.f32 %v1640_v42, %v2514_v50  ;;  %v1649_v50 = vld [vmem:[%s2920_s8] sm:$0xff]  ;;  %v1290_v35 = vadd.f32 %v1289_v32, %v2766_v0  ;;  %s2259_s8 = smov [#allocation3]  }
 0xe10   :  { %s1777_s27 = sshll.u32 %s2259_s8, 4  ;;  %s1778_s27 = int_to_ptr.vmem [resolvable:$true] %s1777_s27 }
 0xe11   :  { %v1645_v45 = vadd.f32 %v1644_v22, %v1641_v43  ;;  %v1646_v47 = vadd.f32 %v1644_v22, %v1642_v44  ;;  %v1291_v60 = vrot.slane %v1290_v35, 2  ;;  %v1717_v22 = vpop.permute.xlu1 %1716  ;;  %s2228_s4 = scalar_lea.vmem %s1778_s27, 16  ;;  %s2232_s16 = scalar_lea.vmem %s1778_s27, 32 }
 0xe12   :  { %p2229_p0 = scmp.ne.s32.totalorder %s1778_s27, %s2228_s4  ;;  %p2233_p1 = scmp.lt.s32.totalorder %s1778_s27, %s1778_s27 }
 0xe13   :  { %v1647_v51 = vsel %vm1597_vm1, %v1645_v45, 0.0  ;;  %v1648_v56 = vsel %vm1598_vm0, %v1646_v47, 0.0  ;;  %v1292_v40 = vadd.f32 %v1291_v60, %v1290_v35  ;;  %v1705_v47 = vand.u32 127, %v159_v23  ;;  %p2234_p2 = scmp.lt.s32.totalorder %s2232_s16, %s2228_s4 }
 0xe14   :  { %v1651_v1 = vmax.f32 %v1647_v51, 1e-30  ;;  %v1652_v61 = vmax.f32 %v1648_v56, 1e-30 }
 0xe15   :  { %v1293_v0 = vrot.slane %v1292_v40, 1  ;;  %v1725_v45 = vpop.permute.xlu1 %1724  ;;  %vm1706_vm8 = vcmp.eq.s32.totalorder %v1705_v47, 0  ;;  %vm1721_vm9 = vcmp.eq.s32.totalorder %v1705_v47, 2  ;;  %vm1729_vm10 = vcmp.eq.s32.totalorder %v1705_v47, 3  ;;  %p2235_p3 = por %p2234_p2, %p2233_p1 }
 0xe16   :  { %2224 = vlog2.f32 %v1651_v1  ;;  %vm1737_vm11 = vcmp.eq.s32.totalorder %v1705_v47, 4  ;;  %vm1745_vm12 = vcmp.eq.s32.totalorder %v1705_v47, 5  ;;  %vm1753_vm13 = vcmp.eq.s32.totalorder %v1705_v47, 6 }
 0xe17   :  { %2226 = vlog2.f32 %v1652_v61  ;;  %v1294_v54 = vadd.f32 %v1293_v0, %v1292_v40  ;;  %vm1761_vm14 = vcmp.eq.s32.totalorder %v1705_v47, 7  ;;  %p2236_p4 = pnand %p2235_p3, %p2229_p0 }
 0xe19   :  { %vm1701_vm7 = vcmp.gt.f32.partialorder %v1294_v54, 0.0 }
 0xe20   :  { %v2225_v10 = vpop.eup %2224 }
 0xe21   :  { %v2227_v52 = vpop.eup %2226  ;;  %v1654_v63 = vmul.f32 0.6931472, %v2225_v10  ;;  %v1727_v10 = vsel %vm1721_vm9, %v1725_v45, 0.0 }
 0xe22   :  { %v1656_v2 = vmul.f32 0.6931472, %v2227_v52 }
 0xe23   :  { %v1657_v15 = vsel %vm1597_vm1, %v1654_v63, -1e+30 }
 0xe24   :  { %v1658_v4 = vsel %vm1598_vm0, %v1656_v2, -1e+30  ;;  %v1659_v5 = vadd.f32 %v1657_v15, %v1649_v50 }
 0xe25   :  { %v1660_v3 = vadd.f32 %v1658_v4, %v1650_v48 }
 0xe26   :  { %v1661_v62 = vsel %vm378_vm5, %v1659_v5, -inf }
 0xe27   :  { %v1662_v16 = vsel %vm378_vm5, %v1660_v3, -inf }
 0xe28   :  { %v1663_v11 = vmax.f32 %v1661_v62, %v1662_v16 }
 0xe2a   :  { %v1664_v12 = vrot.slane %v1663_v11, 4 }
 0xe2c   :  { %v1665_v9 = vmax.f32 %v1663_v11, %v1664_v12 }
 0xe2e   :  { %v1666_v7 = vrot.slane %v1665_v9, 2 }
 0xe30   :  { %v1667_v13 = vmax.f32 %v1665_v9, %v1666_v7 }
 0xe32   :  { %v1668_v6 = vrot.slane %v1667_v13, 1 }
 0xe34   :  { %v1669_v17 = vmax.f32 %v1667_v13, %v1668_v6 }
 0xe36   :  { %vm1670_vm2 = vcmp.ge.f32.partialorder %v1659_v5, %v1669_v17  ;;  %vm1671_vm3 = vcmp.ge.f32.partialorder %v1660_v3, %v1669_v17 }
 0xe37   :  { %v1672_v57 = vsel %vm1670_vm2, %v2537_v29, -1.0  ;;  %v1673_v53 = vsel %vm1671_vm3, %v2539_v30, -1.0 }
 0xe38   :  { %v1674_v19 = vsel %vm378_vm5, %v1672_v57, -inf  ;;  %v1675_v20 = vsel %vm378_vm5, %v1673_v53, -inf }
 0xe39   :  { %v1676_v21 = vmax.f32 %v1674_v19, %v1675_v20 }
 0xe3b   :  { %v1677_v26 = vrot.slane %v1676_v21, 4 }
 0xe3d   :  { %v1678_v27 = vmax.f32 %v1676_v21, %v1677_v26 }
 0xe3f   :  { %v1679_v28 = vrot.slane %v1678_v27, 2 }
 0xe41   :  { %v1680_v33 = vmax.f32 %v1678_v27, %v1679_v28 }
 0xe43   :  { %v1681_v34 = vrot.slane %v1680_v33, 1 }
 0xe45   :  { %v1682_v25 = vmax.f32 %v1680_v33, %v1681_v34 }
 0xe47   :  { %vm1683_vm4 = vcmp.eq.f32.partialorder %v2537_v29, %v1682_v25  ;;  %vm1684_vm6 = vcmp.eq.f32.partialorder %v2539_v30, %v1682_v25 }
 0xe48   :  { %v1854_v14 = vsel %vm1683_vm4, 1.0, %v2254_v8  ;;  %v1855_v36 = vsel %vm1684_vm6, 1.0, %v2254_v8  ;;  %v1700_v8 = vmul.f32 %v2842_v59, %v2839_v49 }
 0xe49   :  { %v1689_v37 = vmul.f32 %v1854_v14, %v1647_v51  ;;  %v1690_v38 = vmul.f32 %v1855_v36, %v1648_v56 }
 0xe4b   :  { %v1691_v39 = vsel %vm378_vm5, %v1689_v37, 0.0  ;;  %v1692_v55 = vsel %vm378_vm5, %v1690_v38, 0.0  ;;  %vm1713_vm5 = vcmp.eq.s32.totalorder %v1705_v47, 1 }
 0xe4c   :  { %v1693_v58 = vadd.f32 %v1692_v55, %v1691_v39  ;;  %v1719_v59 = vsel %vm1713_vm5, %v1717_v22, 0.0 }
 0xe4e   :  { %v1694_v24 = vrot.slane %v1693_v58, 4 }
 0xe50   :  { %v1695_v18 = vadd.f32 %v1694_v24, %v1693_v58 }
 0xe52   :  { %v1696_v31 = vrot.slane %v1695_v18, 2 }
 0xe54   :  { %v1697_v29 = vadd.f32 %v1696_v31, %v1695_v18 }
 0xe56   :  { %v1698_v30 = vrot.slane %v1697_v29, 1 }
 0xe58   :  { %v1699_v42 = vadd.f32 %v1698_v30, %v1697_v29 }
 0xe5a   :  { %1732 = vperm.xlu1 %2168, %v1699_v42   ;;  %v1702_v43 = vsel %vm1701_vm7, 1.0, %v1699_v42 }
 0xe5b   :  { %v1703_v44 = vmul.f32 %v1702_v43, %v1700_v8 }
 0xe5d   :  { %1709 = vperm.xlu0 %2179, %v1703_v44  }
 0xe5e   :  { %1740 = vperm.xlu1 %2168, %v1294_v54  }
 0xe61   :  { %1764 = vperm.xlu0 %2179, %v1682_v25  }
 0xe62   :  { %1748 = vperm.xlu1 %2168, %v2545_v41  }
 0xe66   :  { %1756 = vperm.xlu1 %2168, %v2746_v46  }
 0xed9   :  { %v1733_v51 = vpop.permute.xlu1 %1732 }
 0xeda   :  { %v1735_v41 = vsel %vm1729_vm10, %v1733_v51, 0.0 }
 0xedc   :  { %v1710_v49 = vpop.permute.xlu0 %1709 }
 0xedd   :  { %v1712_v56 = vsel %vm1706_vm8, %v1710_v49, 0.0  ;;  %v1741_v1 = vpop.permute.xlu1 %1740 }
 0xede   :  { %v1720_v61 = vadd.f32 %v1719_v59, %v1712_v56  ;;  %v1743_v63 = vsel %vm1737_vm11, %v1741_v1, 0.0 }
 0xee0   :  { %v1728_v52 = vadd.f32 %v1727_v10, %v1720_v61  ;;  %v1765_v15 = vpop.permute.xlu0 %1764 }
 0xee1   :  { %v1749_v50 = vpop.permute.xlu1 %1748  ;;  %v1767_v62 = vsel %vm1761_vm14, %v1765_v15, 0.0 }
 0xee2   :  { %v1736_v46 = vadd.f32 %v1735_v41, %v1728_v52  ;;  %v1751_v48 = vsel %vm1745_vm12, %v1749_v50, 0.0 }
 0xee4   :  { %v1744_v23 = vadd.f32 %v1743_v63, %v1736_v46 }
 0xee5   :  { %v1757_v2 = vpop.permute.xlu1 %1756 }
 0xee6   :  { %v1752_v4 = vadd.f32 %v1751_v48, %v1744_v23  ;;  %v1759_v5 = vsel %vm1753_vm13, %v1757_v2, 0.0 }
 0xee8   :  { %v1760_v3 = vadd.f32 %v1759_v5, %v1752_v4 }
 0xeea   :  { %v1768_v16 = vadd.f32 %v1767_v62, %v1760_v3 }
 0xeec   :  { %1770 = vst.msk [vmem:[#allocation3] sm:$0x1] %vm1769_vm15, %v1768_v16 }
 0xeed   :  { %2239 = shalt.err (!%p2236_p4)
}
 0xeee   :  { %s2240_s29 = scalar_lea.hbm %s2932_s20, 16 }
 0xeef   :  { %p2241_p5 = scmp.ne.s32.totalorder %s2932_s20, %s2240_s29  ;;  %p2244_p6 = scmp.lt.u32.totalorder %s2240_s29, %s2932_s20 }
 0xef1   :  { %p2246_p7 = pnand %p2244_p6, %p2241_p5 }
 0xef3   :  { %2249 = shalt.err (!%p2246_p7)
}
 0xef4   :  { %1780 = dma.vmem_to_hbm [thread:$0]  %s1778_s27, 16, %s2932_s20, [#allocation4]  }
 0xef5   :  { %2250 = dma.done.wait [#allocation4], 16  }
 0xef6   :  { %2251 = vsyncadd [#allocation4], 4294967280 }
 0xef7   :  { %1784 = vsyncpa [#allocation4], 1 }

</bundles_post_ra>
